<compile_context>
chip_gen: v7x
topology: tpu7x:2x2x1
jax: 0.10.0
libtpu: 0.0.40
codegen_flags: <defaults>
</compile_context>

<pallas_src>
import math

import jax
import jax.numpy as jnp
from jax import lax
from jax.experimental import pallas as pl
from jax.experimental.pallas import tpu as pltpu


def _round_up(x, m):
    return ((x + m - 1) // m) * m


def mlp_kernel(x_ref, g_ref, bta_ref, w1_ref, b1_ref, w2_ref, b2_ref,
               o_ref, h_scr, acc_scr):
    """Grid = (token_tiles, mlp_tiles).

    Token tiles are independent ("parallel").  The mlp axis is a reduction over
    hidden chunks: fc1-chunk -> GELU -> fc2-chunk accumulated into a resident
    f32 scratch; bias2 + residual + store happen on the last chunk.
    """
    m = pl.program_id(1)
    last_m = pl.num_programs(1) - 1

    @pl.when(m == 0)
    def _init():
        # LayerNorm once per token tile (x block is resident across the m axis).
        x = x_ref[...].astype(jnp.float32)                       # (tm, E)
        mean = jnp.mean(x, axis=-1, keepdims=True)
        xc = x - mean
        var = jnp.mean(xc * xc, axis=-1, keepdims=True)
        xn = xc * lax.rsqrt(var + jnp.float32(1e-5))
        h = xn * g_ref[...].astype(jnp.float32) + bta_ref[...].astype(jnp.float32)
        h_scr[...] = h.astype(h_scr.dtype)                       # matmul operand dtype
        acc_scr[...] = jnp.zeros_like(acc_scr)

    # fc1 chunk: (tm, E) @ (E, tk) on the MXU, f32 accumulation.
    h1 = jnp.dot(h_scr[...], w1_ref[...], preferred_element_type=jnp.float32)
    h1 = h1 + b1_ref[...].astype(jnp.float32)                    # (tm, tk)

    # Exact (erf-based) GELU, matching PyTorch nn.GELU() default numerics.
    h1 = 0.5 * h1 * (1.0 + lax.erf(h1 * jnp.float32(1.0 / math.sqrt(2.0))))

    # TODO(synk): dropout is a no-op at inference; training-mode dropout would
    # use pltpu.prng_seed / pltpu.prng_random_bits.

    # fc2 chunk: (tm, tk) @ (tk, E), accumulated into the resident f32 scratch.
    acc_scr[...] += jnp.dot(h1.astype(w2_ref.dtype), w2_ref[...],
                            preferred_element_type=jnp.float32)

    @pl.when(m == last_m)
    def _finalize():
        out = (acc_scr[...] + b2_ref[...].astype(jnp.float32)
               + x_ref[...].astype(jnp.float32))                 # residual add
        o_ref[...] = out.astype(o_ref.dtype)


def mlp_pallas(x, gamma, beta, w1, b1, w2, b2, *,
               block_tokens=256, block_mlp=512,
               compute_dtype=jnp.bfloat16):
    """x: (..., E) float32.  w1: (E, M), w2: (M, E)  (i.e. (in, out) layout).

    block_tokens: token-tile rows (>= 8; 256-1024 recommended).
    block_mlp:    hidden-dim tile (multiple of 128).
    compute_dtype: dtype of MXU operands (bf16 default; f32 for exact mode).
    For best store bandwidth E should be a multiple of 128 (lane-dense output).
    """
    orig_shape = x.shape
    E = orig_shape[-1]
    M = w1.shape[1]
    N = math.prod(orig_shape[:-1])
    x2 = x.reshape(N, E)

    # --- token tiling (pad N so grid = cdiv works without a tail special-case)
    tm = max(8, min(_round_up(block_tokens, 8), _round_up(N, 8)))
    N_pad = _round_up(N, tm)
    if N_pad != N:
        x2 = jnp.pad(x2, ((0, N_pad - N), (0, 0)))

    # --- hidden-dim tiling (zero padding is exact: GELU(0)=0, padded W2 rows=0)
    tk = max(128, min(_round_up(block_mlp, 128), _round_up(M, 128)))
    M_pad = _round_up(M, tk)
    w1p = jnp.pad(w1, ((0, 0), (0, M_pad - M))).astype(compute_dtype)
    b1p = jnp.pad(b1, ((0, M_pad - M),)).reshape(1, M_pad).astype(jnp.float32)
    w2p = jnp.pad(w2, ((0, M_pad - M), (0, 0))).astype(compute_dtype)

    g2 = gamma.reshape(1, E).astype(jnp.float32)
    bt2 = beta.reshape(1, E).astype(jnp.float32)
    b2_2 = b2.reshape(1, E).astype(jnp.float32)

    grid = (N_pad // tm, M_pad // tk)
    wbytes = jnp.dtype(compute_dtype).itemsize

    cost = pl.CostEstimate(
        flops=int(4 * N_pad * E * M_pad),
        transcendentals=int(N_pad * M_pad),
        bytes_accessed=int(2 * N_pad * E * 4            # x in + out
                           + 2 * E * M_pad * wbytes     # W1 + W2
                           + (M_pad + 3 * E) * 4))      # biases + LN params

    # VMEM budget: double-buffered pipeline buffers + scratch, with headroom,
    # clamped below v7x's 64 MiB physical VMEM.
    per_step = 2 * (tm * E * 4            # x tile
                    + E * tk * wbytes     # W1 tile
                    + tk * E * wbytes     # W2 tile
                    + tk * 4 + 3 * E * 4  # biases / LN params
                    + tm * E * 4)         # out tile
    scratch = tm * E * wbytes + tm * E * 4
    vmem_limit = int(min(max(2 * (per_step + scratch) + (2 << 20), 32 << 20),
                         60 << 20))

    out = pl.pallas_call(
        mlp_kernel,
        out_shape=jax.ShapeDtypeStruct((N_pad, E), x.dtype),
        grid_spec=pltpu.PrefetchScalarGridSpec(
            num_scalar_prefetch=0,
            grid=grid,
            in_specs=[
                pl.BlockSpec((tm, E), lambda i, m: (i, 0)),    # x tile (resident over m)
                pl.BlockSpec((1, E), lambda i, m: (0, 0)),     # gamma
                pl.BlockSpec((1, E), lambda i, m: (0, 0)),     # beta
                pl.BlockSpec((E, tk), lambda i, m: (0, m)),    # W1 hidden-chunk
                pl.BlockSpec((1, tk), lambda i, m: (0, m)),    # b1 hidden-chunk
                pl.BlockSpec((tk, E), lambda i, m: (m, 0)),    # W2 hidden-chunk
                pl.BlockSpec((1, E), lambda i, m: (0, 0)),     # b2
            ],
            out_specs=pl.BlockSpec((tm, E), lambda i, m: (i, 0)),
            scratch_shapes=[
                pltpu.VMEM((tm, E), compute_dtype),   # normalized activations
                pltpu.VMEM((tm, E), jnp.float32),     # fc2 accumulator
            ],
        ),
        compiler_params=pltpu.CompilerParams(
            dimension_semantics=("parallel", "arbitrary"),
            vmem_limit_bytes=vmem_limit),
        cost_estimate=cost,
    )(x2, g2, bt2, w1p, b1p, w2p, b2_2)

    return out[:N].reshape(orig_shape)


def mlp_reference(x, gamma, beta, w1, b1, w2, b2):
    xf = x.astype(jnp.float32)
    mean = jnp.mean(xf, axis=-1, keepdims=True)
    var = jnp.mean((xf - mean) ** 2, axis=-1, keepdims=True)
    xn = (xf - mean) * lax.rsqrt(var + jnp.float32(1e-5)) * gamma + beta
    h = jnp.dot(xn, w1, precision=lax.Precision.HIGHEST) + b1
    h = 0.5 * h * (1.0 + lax.erf(h * jnp.float32(1.0 / math.sqrt(2.0))))
    return jnp.dot(h, w2, precision=lax.Precision.HIGHEST) + b2 + xf


if __name__ == "__main__":
    key = jax.random.PRNGKey(0)
    # Small but representative: in MTHPA the MLP sees (B*T*O*N_patches, E)
    # flattened tokens.  E is a multiple of 128 (lane-dense); shapes exercise
    # multi-tile token grid (640 -> 3 tiles of 256, with tail padding) and a
    # 2-step hidden-dim reduction (M=512, tile 256).
    B, S, E, M = 2, 320, 128, 512

    kx, kw1, kb1, kw2, kb2, kg, kb = jax.random.split(key, 7)
    x = jax.random.normal(kx, (B, S, E), dtype=jnp.float32)

    gamma = 1.0 + 0.1 * jax.random.normal(kg, (E,), dtype=jnp.float32)
    beta = 0.1 * jax.random.normal(kb, (E,), dtype=jnp.float32)
    lim1 = 1.0 / math.sqrt(E)
    lim2 = 1.0 / math.sqrt(M)
    w1 = jax.random.uniform(kw1, (E, M), jnp.float32, -lim1, lim1)   # (in, out)
    b1 = jax.random.uniform(kb1, (M,), jnp.float32, -lim1, lim1)
    w2 = jax.random.uniform(kw2, (M, E), jnp.float32, -lim2, lim2)   # (in, out)
    b2 = jax.random.uniform(kb2, (E,), jnp.float32, -lim2, lim2)

    ref = mlp_reference(x, gamma, beta, w1, b1, w2, b2)

    # Default fast path: bf16 MXU operands, f32 accumulation / norm / GELU.
    out_bf16 = mlp_pallas(x, gamma, beta, w1, b1, w2, b2,
                          block_tokens=256, block_mlp=256)
    out_bf16 = jax.block_until_ready(out_bf16)
    assert out_bf16.shape == x.shape
    assert jnp.allclose(out_bf16, ref, atol=2e-2, rtol=2e-2), "bf16 path mismatch"

    # Full-f32 compute path (tighter numerics, slower MXU).
    out_f32 = mlp_pallas(x, gamma, beta, w1, b1, w2, b2,
                         block_tokens=256, block_mlp=256,
                         compute_dtype=jnp.float32)
    out_f32 = jax.block_until_ready(out_f32)
    assert jnp.allclose(out_f32, ref, atol=2e-2, rtol=2e-2), "f32 path mismatch"

    print("KERNEL_OK")
</pallas_src>

<mosaic_0001>
module attributes {stable_mosaic.version = 11 : i64} {
  func.func @mlp_kernel(%arg0: i32, %arg1: i32, %arg2: memref<256x128xf32, #tpu.memory_space<vmem>>, %arg3: memref<1x128xf32, #tpu.memory_space<vmem>>, %arg4: memref<1x128xf32, #tpu.memory_space<vmem>>, %arg5: memref<128x256xbf16, #tpu.memory_space<vmem>>, %arg6: memref<1x256xf32, #tpu.memory_space<vmem>>, %arg7: memref<256x128xbf16, #tpu.memory_space<vmem>>, %arg8: memref<1x128xf32, #tpu.memory_space<vmem>>, %arg9: memref<256x128xf32, #tpu.memory_space<vmem>>, %arg10: memref<256x128xbf16, #tpu.memory_space<vmem>>, %arg11: memref<256x128xf32, #tpu.memory_space<vmem>>) attributes {dimension_semantics = [#tpu.dimension_semantics<parallel>, #tpu.dimension_semantics<arbitrary>], iteration_bounds = array<i64: 3, 2>, scalar_prefetch = 0 : i64, scratch_operands = 2 : i64, tpu.core_type = #tpu.core_type<tc>, window_params = [{transform_indices = @transform_0, window_bounds = array<i64: 256, 128>}, {pipeline_mode = #tpu.pipeline_mode<synchronous>, transform_indices = @transform_1, window_bounds = array<i64: 1, 128>}, {pipeline_mode = #tpu.pipeline_mode<synchronous>, transform_indices = @transform_2, window_bounds = array<i64: 1, 128>}, {transform_indices = @transform_3, window_bounds = array<i64: 128, 256>}, {transform_indices = @transform_4, window_bounds = array<i64: 1, 256>}, {transform_indices = @transform_5, window_bounds = array<i64: 256, 128>}, {pipeline_mode = #tpu.pipeline_mode<synchronous>, transform_indices = @transform_6, window_bounds = array<i64: 1, 128>}, {transform_indices = @transform_7, window_bounds = array<i64: 256, 128>}]} {
    %c0_i32 = arith.constant 0 : i32
    %0 = arith.cmpi eq, %arg1, %c0_i32 : i32
    %1 = arith.extui %0 : i1 to i32
    %c0_i32_0 = arith.constant 0 : i32
    %2 = arith.cmpi ne, %1, %c0_i32_0 : i32
    scf.if %2 {
      %c0_17 = arith.constant 0 : index
      %c0_18 = arith.constant 0 : index
      %26 = vector.load %arg2[%c0_17, %c0_18] : memref<256x128xf32, #tpu.memory_space<vmem>>, vector<256x128xf32>
      %cst_19 = arith.constant dense<0.000000e+00> : vector<256xf32>
      %27 = vector.multi_reduction <add>, %26, %cst_19 [1] : vector<256x128xf32> to vector<256xf32>
      %28 = vector.shape_cast %27 : vector<256xf32> to vector<256x1xf32>
      %cst_20 = arith.constant 1.280000e+02 : f32
      %29 = vector.broadcast %cst_20 : f32 to vector<256x1xf32>
      %30 = arith.divf %28, %29 : vector<256x1xf32>
      %31 = vector.broadcast %30 : vector<256x1xf32> to vector<256x128xf32>
      %32 = arith.subf %26, %31 : vector<256x128xf32>
      %33 = arith.mulf %32, %32 : vector<256x128xf32>
      %cst_21 = arith.constant dense<0.000000e+00> : vector<256xf32>
      %34 = vector.multi_reduction <add>, %33, %cst_21 [1] : vector<256x128xf32> to vector<256xf32>
      %35 = vector.shape_cast %34 : vector<256xf32> to vector<256x1xf32>
      %cst_22 = arith.constant 1.280000e+02 : f32
      %36 = vector.broadcast %cst_22 : f32 to vector<256x1xf32>
      %37 = arith.divf %35, %36 : vector<256x1xf32>
      %cst_23 = arith.constant 9.99999974E-6 : f32
      %38 = vector.broadcast %cst_23 : f32 to vector<256x1xf32>
      %39 = arith.addf %37, %38 : vector<256x1xf32>
      %40 = math.rsqrt %39 : vector<256x1xf32>
      %41 = vector.broadcast %40 : vector<256x1xf32> to vector<256x128xf32>
      %42 = arith.mulf %32, %41 : vector<256x128xf32>
      %c0_24 = arith.constant 0 : index
      %c0_25 = arith.constant 0 : index
      %43 = vector.load %arg3[%c0_24, %c0_25] : memref<1x128xf32, #tpu.memory_space<vmem>>, vector<1x128xf32>
      %44 = vector.broadcast %43 : vector<1x128xf32> to vector<256x128xf32>
      %45 = arith.mulf %42, %44 : vector<256x128xf32>
      %c0_26 = arith.constant 0 : index
      %c0_27 = arith.constant 0 : index
      %46 = vector.load %arg4[%c0_26, %c0_27] : memref<1x128xf32, #tpu.memory_space<vmem>>, vector<1x128xf32>
      %47 = vector.broadcast %46 : vector<1x128xf32> to vector<256x128xf32>
      %48 = arith.addf %45, %47 : vector<256x128xf32>
      %49 = arith.truncf %48 : vector<256x128xf32> to vector<256x128xbf16>
      %c0_28 = arith.constant 0 : index
      %c0_29 = arith.constant 0 : index
      %50 = vector.load %arg10[%c0_28, %c0_29] : memref<256x128xbf16, #tpu.memory_space<vmem>>, vector<256x128xbf16>
      tpu.vector_store %arg10[%c0_28, %c0_29], %49 {strides = array<i32>} : memref<256x128xbf16, #tpu.memory_space<vmem>>, vector<256x128xbf16>,
      %cst_30 = arith.constant 0.000000e+00 : f32
      %51 = vector.broadcast %cst_30 : f32 to vector<256x128xf32>
      %c0_31 = arith.constant 0 : index
      %c0_32 = arith.constant 0 : index
      %52 = vector.load %arg11[%c0_31, %c0_32] : memref<256x128xf32, #tpu.memory_space<vmem>>, vector<256x128xf32>
      tpu.vector_store %arg11[%c0_31, %c0_32], %51 {strides = array<i32>} : memref<256x128xf32, #tpu.memory_space<vmem>>, vector<256x128xf32>,
    } else {
    }
    %c0 = arith.constant 0 : index
    %c0_1 = arith.constant 0 : index
    %3 = vector.load %arg10[%c0, %c0_1] : memref<256x128xbf16, #tpu.memory_space<vmem>>, vector<256x128xbf16>
    %c0_2 = arith.constant 0 : index
    %c0_3 = arith.constant 0 : index
    %4 = vector.load %arg5[%c0_2, %c0_3] : memref<128x256xbf16, #tpu.memory_space<vmem>>, vector<128x256xbf16>
    %cst = arith.constant dense<0.000000e+00> : vector<256x256xf32>
    %5 = tpu.matmul %3, %4, %cst {dimension_numbers = #tpu.dot_dimension_numbers<[1], [0], [0], [1], [0, 0, 1, 1], [], []>} : vector<256x128xbf16>, vector<128x256xbf16>, vector<256x256xf32> -> vector<256x256xf32>
    %c0_4 = arith.constant 0 : index
    %c0_5 = arith.constant 0 : index
    %6 = vector.load %arg6[%c0_4, %c0_5] : memref<1x256xf32, #tpu.memory_space<vmem>>, vector<1x256xf32>
    %7 = vector.broadcast %6 : vector<1x256xf32> to vector<256x256xf32>
    %8 = arith.addf %5, %7 : vector<256x256xf32>
    %cst_6 = arith.constant 5.000000e-01 : f32
    %9 = vector.broadcast %cst_6 : f32 to vector<256x256xf32>
    %10 = arith.mulf %9, %8 : vector<256x256xf32>
    %cst_7 = arith.constant 0.707106769 : f32
    %11 = vector.broadcast %cst_7 : f32 to vector<256x256xf32>
    %12 = arith.mulf %8, %11 : vector<256x256xf32>
    %13 = math.erf %12 : vector<256x256xf32>
    %cst_8 = arith.constant 1.000000e+00 : f32
    %14 = vector.broadcast %cst_8 : f32 to vector<256x256xf32>
    %15 = arith.addf %14, %13 : vector<256x256xf32>
    %16 = arith.mulf %10, %15 : vector<256x256xf32>
    %c0_9 = arith.constant 0 : index
    %c0_10 = arith.constant 0 : index
    %17 = vector.load %arg11[%c0_9, %c0_10] : memref<256x128xf32, #tpu.memory_space<vmem>>, vector<256x128xf32>
    %18 = arith.truncf %16 : vector<256x256xf32> to vector<256x256xbf16>
    %c0_11 = arith.constant 0 : index
    %c0_12 = arith.constant 0 : index
    %19 = vector.load %arg7[%c0_11, %c0_12] : memref<256x128xbf16, #tpu.memory_space<vmem>>, vector<256x128xbf16>
    %cst_13 = arith.constant dense<0.000000e+00> : vector<256x128xf32>
    %20 = tpu.matmul %18, %19, %cst_13 {dimension_numbers = #tpu.dot_dimension_numbers<[1], [0], [0], [1], [0, 0, 1, 1], [], []>} : vector<256x256xbf16>, vector<256x128xbf16>, vector<256x128xf32> -> vector<256x128xf32>
    %21 = arith.addf %17, %20 : vector<256x128xf32>
    %c0_14 = arith.constant 0 : index
    %c0_15 = arith.constant 0 : index
    %22 = vector.load %arg11[%c0_14, %c0_15] : memref<256x128xf32, #tpu.memory_space<vmem>>, vector<256x128xf32>
    tpu.vector_store %arg11[%c0_14, %c0_15], %21 {strides = array<i32>} : memref<256x128xf32, #tpu.memory_space<vmem>>, vector<256x128xf32>,
    %c1_i32 = arith.constant 1 : i32
    %23 = arith.cmpi eq, %arg1, %c1_i32 : i32
    %24 = arith.extui %23 : i1 to i32
    %c0_i32_16 = arith.constant 0 : i32
    %25 = arith.cmpi ne, %24, %c0_i32_16 : i32
    scf.if %25 {
      %c0_17 = arith.constant 0 : index
      %c0_18 = arith.constant 0 : index
      %26 = vector.load %arg11[%c0_17, %c0_18] : memref<256x128xf32, #tpu.memory_space<vmem>>, vector<256x128xf32>
      %c0_19 = arith.constant 0 : index
      %c0_20 = arith.constant 0 : index
      %27 = vector.load %arg8[%c0_19, %c0_20] : memref<1x128xf32, #tpu.memory_space<vmem>>, vector<1x128xf32>
      %28 = vector.broadcast %27 : vector<1x128xf32> to vector<256x128xf32>
      %29 = arith.addf %26, %28 : vector<256x128xf32>
      %c0_21 = arith.constant 0 : index
      %c0_22 = arith.constant 0 : index
      %30 = vector.load %arg2[%c0_21, %c0_22] : memref<256x128xf32, #tpu.memory_space<vmem>>, vector<256x128xf32>
      %31 = arith.addf %29, %30 : vector<256x128xf32>
      %c0_23 = arith.constant 0 : index
      %c0_24 = arith.constant 0 : index
      %32 = vector.load %arg9[%c0_23, %c0_24] : memref<256x128xf32, #tpu.memory_space<vmem>>, vector<256x128xf32>
      tpu.vector_store %arg9[%c0_23, %c0_24], %31 {strides = array<i32>} : memref<256x128xf32, #tpu.memory_space<vmem>>, vector<256x128xf32>,
    } else {
    }
    return
  }
  func.func @transform_0(%arg0: i32, %arg1: i32) -> (i32, i32) {
    %c0_i32 = arith.constant 0 : i32
    %c0_i32_0 = arith.constant 0 : i32
    return %arg0, %c0_i32 : i32, i32
  }
  func.func @transform_1(%arg0: i32, %arg1: i32) -> (i32, i32) {
    %c0_i32 = arith.constant 0 : i32
    %c0_i32_0 = arith.constant 0 : i32
    %c0_i32_1 = arith.constant 0 : i32
    return %c0_i32, %c0_i32_0 : i32, i32
  }
  func.func @transform_2(%arg0: i32, %arg1: i32) -> (i32, i32) {
    %c0_i32 = arith.constant 0 : i32
    %c0_i32_0 = arith.constant 0 : i32
    %c0_i32_1 = arith.constant 0 : i32
    return %c0_i32, %c0_i32_0 : i32, i32
  }
  func.func @transform_3(%arg0: i32, %arg1: i32) -> (i32, i32) {
    %c0_i32 = arith.constant 0 : i32
    %c0_i32_0 = arith.constant 0 : i32
    return %c0_i32, %arg1 : i32, i32
  }
  func.func @transform_4(%arg0: i32, %arg1: i32) -> (i32, i32) {
    %c0_i32 = arith.constant 0 : i32
    %c0_i32_0 = arith.constant 0 : i32
    return %c0_i32, %arg1 : i32, i32
  }
  func.func @transform_5(%arg0: i32, %arg1: i32) -> (i32, i32) {
    %c0_i32 = arith.constant 0 : i32
    %c0_i32_0 = arith.constant 0 : i32
    return %arg1, %c0_i32 : i32, i32
  }
  func.func @transform_6(%arg0: i32, %arg1: i32) -> (i32, i32) {
    %c0_i32 = arith.constant 0 : i32
    %c0_i32_0 = arith.constant 0 : i32
    %c0_i32_1 = arith.constant 0 : i32
    return %c0_i32, %c0_i32_0 : i32, i32
  }
  func.func @transform_7(%arg0: i32, %arg1: i32) -> (i32, i32) {
    %c0_i32 = arith.constant 0 : i32
    %c0_i32_0 = arith.constant 0 : i32
    return %arg0, %c0_i32 : i32, i32
  }
}

</mosaic_0001>

<bundles_post_ra>
// kernel: tpu_custom_call.1
= control target key start
LH: loop header
LB: loop body
LE: loop exit
PB: predicated region body
PF: predicated region fallthrough
CT: control target
= control target key end

     0   :  { %s4290_s0 = inlined_call_operand.hbm [shape: f32[768,128], index: 0, kind: input, shape index: {}]   ;;  %s4291_s1 = inlined_call_operand.vmem [shape: f32[1,128], index: 1, kind: input, shape index: {}]   ;;  %s4292_s2 = inlined_call_operand.vmem [shape: f32[1,128], index: 2, kind: input, shape index: {}]   ;;  %s4293_s3 = inlined_call_operand.hbm [shape: bf16[128,512], index: 3, kind: input, shape index: {}]   ;;  %s4294_s4 = inlined_call_operand.vmem [shape: f32[1,512], index: 4, kind: input, shape index: {}]   ;;  %s4295_s5 = inlined_call_operand.hbm [shape: bf16[512,128], index: 5, kind: input, shape index: {}]   ;;  %s4296_s6 = inlined_call_operand.vmem [shape: f32[1,128], index: 6, kind: input, shape index: {}]   ;;  %s4297_s7 = inlined_call_operand.hbm [shape: f32[768,128], index: 7, kind: output, shape index: {}]  }
   0x1   :  { %4312 = sst [smem:[#allocation22_spill]] %s4291_s1 }
   0x2   :  { %4313 = sst [smem:[#allocation23_spill]] %s4292_s2 }
   0x3   :  { %4314 = sst [smem:[#allocation24_spill]] %s4293_s3 }
   0x4   :  { %4315 = sst [smem:[#allocation25_spill]] %s4296_s6 }
   0x5   :  { %4316 = sst [smem:[#allocation26_spill]] %s4297_s7 }
   0x6   :  { %12 = vsyncpa [#allocation5], 0 }
   0x7   :  { %14 = vsyncpa [#allocation5 + $0x1], 0 }
   0x8   :  { %15 = vsyncpa [#allocation8], 0 }
   0x9   :  { %17 = vsyncpa [#allocation8 + $0x1], 0 }
   0xa   :  { %18 = vsyncpa [#allocation6], 0 }
   0xb   :  { %20 = vsyncpa [#allocation6 + $0x1], 0  ;;  %s3117_s24 = smov 0   ;;  %s3119_s25 = smov 0  }
   0xc   :  { %s3121_s26 = smov 0   ;;  %s3123_s27 = smov 0  }
   0xd   :  { %s3125_s28 = smov 0   ;;  %s3127_s29 = smov 0  }
   0xe   :  { %s3129_s30 = smov 0   ;;  %s3131_s8 = smov 0  }
   0xf   :  { %s3133_s9 = smov 0   ;;  %s3135_s10 = smov 0  }
  0x10   :  { %s3137_s11 = smov 0  }
  0x11 LB: > { %4317 = sst [smem:[#allocation14_spill]] %s3030_s26  ;;  %s35_s12 = sadd.s32 1, %s3054_s9  ;;  %s3062_s11 = sphi %s3137_s11, %s26_s11   ;;  %s3058_s10 = sphi %s3135_s10, %s4359_s10   ;;  %s3054_s9 = sphi %s3133_s9, %s4365_s9   ;;  %s3050_s8 = sphi %s3131_s8, %s4357_s8   ;;  %s3046_s30 = sphi %s3129_s30, %s4364_s30   ;;  %s3042_s29 = sphi %s3127_s29, %s4356_s29   ;;  %s3038_s28 = sphi %s3125_s28, %s4363_s28   ;;  %s3034_s27 = sphi %s3123_s27, %s4362_s27   ;;  %s3030_s26 = sphi %s3121_s26, %s4354_s26   ;;  %s3026_s25 = sphi %s3119_s25, %s4361_s25   ;;  %s3022_s24 = sphi %s3117_s24, %s4360_s24  }
  0x12   : > { %4318 = sst [smem:[#allocation15_spill]] %s3042_s29  ;;  %p4301_p0 = scmp.eq.s32.totalorder %s3062_s11, 0 }
  0x13   : > { %4319 = sst [smem:[#allocation16_spill]] %s3050_s8  ;;  %p3174_p1 = scmp.ge.s32.totalorder %s35_s12, 2 }
  0x14   : > { %4320 = sst [smem:[#allocation17_spill]] %s3058_s10  ;;  %s113_s14 = sadd.s32 1, %s3030_s26 }
  0x15   : > { %p120_p2 = scmp.ne.s32.totalorder %s3030_s26, %s3026_s25  ;;  %s4367_s12 = smov (%p3174_p1, %s35_s12), 0 }
  0x16   : > { %4322 = sst [smem:[#allocation18_spill]] %s4367_s12  ;;  %s110_s15 = ssub.s32 %s3054_s9, %s4367_s12 }
  0x17   : > { %p122_p4 = por %p120_p2, %p4301_p0  ;;  %p4300_p5 = scmp.lt.s32.totalorder %s3062_s11, 6 }
  0x18   : > { %p111_p6 = scmp.eq.s32.totalorder %s110_s15, 0  ;;  %s279_s16 = sand.u32 1, %s3062_s11  }
  0x19   : > { %s281_s18 = sand.u32 1, %s3030_s26   ;;  %s2378_s20 = sshll.u32 %s3054_s9, 7 }
  0x1a   : > { %s3194_s17 = scalar_select %p111_p6, %s3030_s26, %s113_s14  }
  0x1b   : > { %s3197_s19 = sshll.u32 %s281_s18, 7  ;;  %s4324_s3 = sld [smem:[#allocation24_spill]] }
  0x1c   : > { %4323 = sst [smem:[#allocation19_spill]] %s3194_s17  ;;  %s283_s12 = scalar_lea.vmem [#allocation7], %s3197_s19 }
  0x1d   : > { %s290_s7 = sshll.u32 %s283_s12, 4  ;;  %p3208_p7 = pnand %p4300_p5, %p122_p4  ;;  %s3212_s7 = int_to_ptr.vmem [resolvable:$true] %s290_s7 }
  0x1e   : > { %s3215_s15 = scalar_lea.sflag [#allocation8], %s279_s16 }
  0x1f   : > { %p4303_p10 = pneg %p3208_p7 }
  0x21   : > { %s3203_s23 = scalar_lea.hbm %s4324_s3, %s2378_s20  ;;  %s2851_s21 = scalar_lea.hbm %s4324_s3, 4096 }
  0x22   : > { %s2846_s18 = scalar_lea.hbm %s3203_s23, 2048  ;;  %p2852_p13 = scmp.lt.u32.totalorder %s3203_s23, %s4324_s3 }
  0x23   : > { %p2847_p9 = scmp.ne.s32.totalorder %s3203_s23, %s2846_s18  ;;  %p2853_p2 = scmp.lt.u32.totalorder %s2851_s21, %s2846_s18 }
  0x24   : > { %p2855_p6 = scmp.lt.u32.totalorder %s2846_s18, %s3203_s23 }
  0x25   : > { %p2849_p11 = pnand %p4303_p10, %p2847_p9  ;;  %p2854_p4 = por %p2853_p2, %p2852_p13 }
  0x27   : > { %p2850_p12 = pneg %p2849_p11  ;;  %p2856_p5 = por %p2855_p6, %p2854_p4 }
  0x29   : > { %p2857_p3 = pnand %p2856_p5, %p2850_p12 }
  0x2b   : > { %2860 = shalt.err (!%p2857_p3)
}
  0x2c   : > { %s2861_s16 = scalar_lea.vmem %s3212_s7, 2048  ;;  %s3064_s12 = smov [#allocation7]  }
  0x2d   : > { %p2862_p9 = scmp.ne.s32.totalorder %s3212_s7, %s2861_s16  ;;  %s2866_s20 = sshll.u32 %s3064_s12, 4  ;;  %s2867_s20 = int_to_ptr.vmem [resolvable:$false] %s2866_s20 }
  0x2e   : > { %s2868_s17 = scalar_lea.vmem %s2867_s20, 4096  ;;  %p2869_p8 = scmp.lt.s32.totalorder %s3212_s7, %s2867_s20 }
  0x2f   : > { %p2864_p11 = pnand %p2862_p9, %p4303_p10  ;;  %p2870_p13 = scmp.lt.s32.totalorder %s2868_s17, %s2861_s16 }
  0x31   : > { %p2865_p0 = pneg %p2864_p11  ;;  %p2871_p2 = por %p2870_p13, %p2869_p8 }
  0x33   : > { %p2872_p4 = pnand %p2871_p2, %p2865_p0 }
  0x35   : > { %2875 = shalt.err (!%p2872_p4)
}
  0x36   : > { %s3065_s18 = smov 256   ;;  %s4302_s21 = smov 128  }
  0x37   : > { %s4304_s22 = smov 8   ;;  %p327_p0 = scmp.lt.s32.totalorder %s3062_s11, 7 }
  0x38   : > { %2507 = dma.hbm_to_vmem [thread:$0]  (!%p3208_p7), %s3203_s23, 2048, %s3212_s7, %s3215_s15, %s3065_s18, %s4302_s21, %s4304_s22  }
  0x39   : > { %p4326_p3 = scmp.ge.s32.totalorder %s3062_s11, 1  ;;  %s3253_s12 = sadd.s32 4294967295, %s3062_s11  }
  0x3a   : > { %s2317_s20 = sadd.s32 4294967294, %s3062_s11   ;;  %s38_s17 = sadd.s32 1, %s3058_s10 }
  0x3b   : > { %p3248_p5 = pnand %p4326_p3, %p327_p0  ;;  %s45_s3 = sadd.s32 1, %s3042_s29 }
  0x3c   : > { %s4369_s17 = smov (!%p3174_p1, %s38_s17), %s3058_s10  ;;  %p52_p8 = scmp.ne.s32.totalorder %s3042_s29, %s3038_s28 }
  0x3d   : > { %s4327_s16 = scalar_select %p3248_p5, 1, 0 }
  0x3e   : > { %p58_p12 = scmp.ne.s32.totalorder %s3038_s28, %s3034_s27  ;;  %p40_p6 = scmp.ge.s32.totalorder %s4369_s17, 3 }
  0x3f   : > { %p59_p9 = scmp.eq.s32.totalorder %s3253_s12, 0  ;;  %p4328_p11 = scmp.eq.s32.totalorder %s3062_s11, 0 }
  0x40   : > { %p223_p2 = scmp.eq.s32.totalorder %s3253_s12, 5  ;;  %s4371_s17 = smov (%p40_p6, %s4369_s17), 0 }
  0x41   : > { %p3268_p13 = por %p4328_p11, %p52_p8  ;;  %4330 = sst [smem:[#allocation20_spill]] %s4371_s17 }
  0x42   : > { %p3278_p1 = por %p59_p9, %p58_p12  ;;  %p4332_p4 = scmp.ne.s32.totalorder %s3026_s25, %s3022_s24 }
  0x43   : > { %s42_s18 = ssub.s32 %s3058_s10, %s4371_s17  ;;  %p3291_p3 = por %p223_p2, %p52_p8 }
  0x44   : > { %s4331_s13 = scalar_select %p3278_p1, 1, 0 }
  0x45   : > { %p3285_p0 = por %p4332_p4, %p59_p9  ;;  %p43_p11 = scmp.eq.s32.totalorder %s42_s18, 0 }
  0x46   : > { %s4334_s21 = scalar_select %p3291_p3, 1, 0 }
  0x47   : > { %s4333_s23 = scalar_select %p3285_p0, 1, 0 }
  0x48   : > { %p229_p10 = scmp.eq.s32.totalorder %s2317_s20, 5  ;;  %s258_s22 = sand.u32 1, %s3042_s29  }
  0x49   : > { %s2377_s26 = sshll.u32 %s3058_s10, 12  ;;  %s2320_s24 = sshll.u32 %s258_s22, 8 }
  0x4a   : > { %s3298_s8 = scalar_select %p43_p11, %s3042_s29, %s45_s3  }
  0x4b   : > { %p3303_p6 = por %p229_p10, %p58_p12  ;;  %s3310_s17 = scalar_lea.hbm %s4290_s0, %s2377_s26 }
  0x4c   : > { %4335 = sst [smem:[#allocation21_spill]] %s3298_s8  ;;  %p4337_p8 = scmp.lt.s32.totalorder %s3062_s11, 6 }
  0x4d   : > { %s4336_s6 = scalar_select %p3303_p6, 1, 0 }
  0x4e   : > { %p3316_p9 = pnand %p4337_p8, %p3268_p13  ;;  %s262_s20 = scalar_lea.vmem [#allocation4], %s2320_s24 }
  0x4f   : > { %s269_s18 = sshll.u32 %s262_s20, 4  ;;  %s3322_s10 = scalar_lea.sflag [#allocation5], %s258_s22  ;;  %s3320_s18 = int_to_ptr.vmem [resolvable:$true] %s269_s18 }
  0x50   : > { %s2876_s1 = scalar_lea.hbm %s3310_s17, 4096  ;;  %p2878_p12 = pneg %p3316_p9 }
  0x51   : > { %p2877_p10 = scmp.ne.s32.totalorder %s3310_s17, %s2876_s1  ;;  %s2881_s7 = scalar_lea.hbm %s4290_s0, 12288 }
  0x52   : > { %p2882_p13 = scmp.lt.u32.totalorder %s3310_s17, %s4290_s0  ;;  %p2883_p11 = scmp.lt.u32.totalorder %s2881_s7, %s2876_s1 }
  0x53   : > { %p2879_p2 = pnand %p2878_p12, %p2877_p10  ;;  %p2885_p6 = scmp.lt.u32.totalorder %s2876_s1, %s3310_s17 }
  0x54   : > { %p2884_p8 = por %p2883_p11, %p2882_p13 }
  0x55   : > { %p2880_p4 = pneg %p2879_p2 }
  0x56   : > { %p2886_p3 = por %p2885_p6, %p2884_p8 }
  0x58   : > { %p2887_p0 = pnand %p2886_p3, %p2880_p4 }
  0x5a   : > { %2890 = shalt.err (!%p2887_p0)
}
  0x5b   : > { %s2891_s22 = scalar_lea.vmem %s3320_s18, 4096  ;;  %s3068_s24 = smov [#allocation4]  }
  0x5c   : > { %p2892_p10 = scmp.ne.s32.totalorder %s3320_s18, %s2891_s22  ;;  %s2896_s20 = sshll.u32 %s3068_s24, 4  ;;  %s2897_s20 = int_to_ptr.vmem [resolvable:$false] %s2896_s20 }
  0x5d   : > { %s2898_s29 = scalar_lea.vmem %s2897_s20, 8192  ;;  %p2899_p5 = scmp.lt.s32.totalorder %s3320_s18, %s2897_s20 }
  0x5e   : > { %p2894_p2 = pnand %p2892_p10, %p2878_p12  ;;  %p2900_p13 = scmp.lt.s32.totalorder %s2898_s29, %s2891_s22 }
  0x60   : > { %p2895_p1 = pneg %p2894_p2  ;;  %p2901_p11 = por %p2900_p13, %p2899_p5 }
  0x62   : > { %p2902_p6 = pnand %p2901_p11, %p2895_p1 }
  0x64   : > { %2905 = shalt.err (!%p2902_p6)
}
  0x65   : > { %s4339_s8 = smov 8   ;;  %s4340_s1 = smov 128  }
  0x66   : > { %2504 = dma.hbm_to_vmem [thread:$0]  (!%p3316_p9), %s3310_s17, 4096, %s3320_s18, %s3322_s10, %s4340_s1, %s4340_s1, %s4339_s8  }
  0x67   : > { %s2379_s2 = sshll.u32 %s3054_s9, 11  ;;  %s312_s26 = scalar_lea.vmem [#allocation9], %s3197_s19 }
  0x68   : > { %s319_s7 = sshll.u32 %s312_s26, 4  ;;  %s3358_s20 = scalar_lea.hbm %s4295_s5, %s2379_s2  ;;  %s3360_s7 = int_to_ptr.vmem [resolvable:$true] %s319_s7 }
  0x69   : > { %s2906_s3 = scalar_lea.hbm %s3358_s20, 2048  ;;  %p4341_p1 = pneg %p3208_p7 }
  0x6a   : > { %p2907_p5 = scmp.ne.s32.totalorder %s3358_s20, %s2906_s3  ;;  %s2911_s17 = scalar_lea.hbm %s4295_s5, 4096 }
  0x6b   : > { %p2912_p9 = scmp.lt.u32.totalorder %s3358_s20, %s4295_s5  ;;  %p2913_p12 = scmp.lt.u32.totalorder %s2911_s17, %s2906_s3 }
  0x6c   : > { %p2909_p0 = pnand %p2907_p5, %p4341_p1  ;;  %p2915_p8 = scmp.lt.u32.totalorder %s2906_s3, %s3358_s20 }
  0x6d   : > { %p2914_p4 = por %p2913_p12, %p2912_p9 }
  0x6e   : > { %p2910_p3 = pneg %p2909_p0 }
  0x6f   : > { %p2916_p10 = por %p2915_p8, %p2914_p4 }
  0x71   : > { %p2917_p2 = pnand %p2916_p10, %p2910_p3 }
  0x73   : > { %2920 = shalt.err (!%p2917_p2)
}
  0x74   : > { %s2921_s8 = scalar_lea.vmem %s3360_s7, 2048  ;;  %p4342_p11 = pmov %p4341_p1 }
  0x75   : > { %p2922_p13 = scmp.ne.s32.totalorder %s3360_s7, %s2921_s8  ;;  %s3069_s1 = smov [#allocation9]  }
  0x76   : > { %s2926_s2 = sshll.u32 %s3069_s1, 4  ;;  %s2927_s2 = int_to_ptr.vmem [resolvable:$false] %s2926_s2 }
  0x77   : > { %p2924_p6 = pnand %p2922_p13, %p4342_p11  ;;  %s2928_s26 = scalar_lea.vmem %s2927_s2, 4096 }
  0x78   : > { %p2929_p1 = scmp.lt.s32.totalorder %s3360_s7, %s2927_s2  ;;  %p2930_p0 = scmp.lt.s32.totalorder %s2928_s26, %s2921_s8 }
  0x79   : > { %p2925_p5 = pneg %p2924_p6 }
  0x7a   : > { %p2931_p9 = por %p2930_p0, %p2929_p1 }
  0x7c   : > { %p2932_p12 = pnand %p2931_p9, %p2925_p5 }
  0x7e   : > { %2935 = shalt.err (!%p2932_p12)
}
  0x7f   : > { %s3070_s24 = smov 64   ;;  %s3071_s22 = smov 4  }
  0x80   : > { %2510 = dma.hbm_to_vmem [thread:$0]  (!%p3208_p7), %s3358_s20, 2048, %s3360_s7, %s3215_s15, %s3070_s24, %s3070_s24, %s3071_s22  }
  0x81   : > { %p4343_p3 = scmp.ne.s32.totalorder %s4327_s16, 0 }
  0x82   : > { %s3389_s3 = sand.u32 (!%p4343_p3), 1, %s3038_s28   ;;  %p4344_p4 = scmp.ne.s32.totalorder (!%p4343_p3), %s4331_s13, 0 }
  0x83   : > { %331 = sbr.rel (%p4343_p3) target bundleno = 1176 (0x498), region = 48  ;;  %s2330_s10 = sshll.u32 (!%p4343_p3), %s3389_s3, 8 }
  0x84   : > { %s334_s19 = scalar_lea.sflag (!%p4343_p3), [#allocation5], %s3389_s3  ;;  %s3393_s17 = scalar_lea.vmem (!%p4343_p3), [#allocation4], %s2330_s10 }
  0x8a   : > { %3009 = dma.done.wait (%p4344_p4), %s334_s19, 4096  }
  0x8b   : > { %3011 = vsyncadd (%p4344_p4), %s334_s19, 4294963200  ;;  %s342_s14 = sand.u32 1, %s3253_s12   ;;  %s344_s15 = sand.u32 1, %s3026_s25  }
  0x8c   : > { %s2331_s16 = sshll.u32 %s344_s15, 7  ;;  %s343_s7 = scalar_lea.sflag [#allocation8], %s342_s14 }
  0x8d   : > { %s3401_s20 = scalar_lea.vmem [#allocation7], %s2331_s16  ;;  %p4345_p7 = scmp.ne.s32.totalorder %s4333_s23, 0 }
  0x8f   : > { %3013 = dma.done.wait (%p4345_p7), %s343_s7, 4096  }
  0x90   : > { %3015 = vsyncadd (%p4345_p7), %s343_s7, 4294963200  ;;  %s2334_s18 = sshll.u32 %s3046_s30, 1  ;;  %s3414_s8 = scalar_lea.vmem [#allocation9], %s2331_s16 }
  0x91   : > { %p403_p8 = scmp.lt.s32.totalorder %s2334_s18, 3  ;;  %s3416_s1 = scalar_lea.vmem [#allocation10], %s2330_s10 }
  0x92   : > { %p2335_p10 = scmp.ne.s32.totalorder %s3046_s30, 0 }
  0x93   : > { %s4373_s18 = smov (!%p403_p8, %s2334_s18), 3  ;;  %v3420_v0 = vld [vmem:[%s3393_s17] sm:$0xff] (!%p2335_p10)  ;;  %v3423_v1 = vld [vmem:[%s3393_s17 + $0x10] sm:$0xff] (!%p2335_p10)  ;;  %v3428_v2 = vld [vmem:[%s3393_s17 + $0x8] sm:$0xff] (!%p2335_p10)  ;;  %s4346_s26 = sld [smem:[#allocation22_spill]] (!%p2335_p10) }
  0x94   : > { %s405_s12 = scalar_lea.vmem %s4294_s4, %s4373_s18  ;;  %413 = sbr.rel (%p2335_p10) target bundleno = 526 (0x20e), region = 64  ;;  %446 = vadd.xlane.f32.xlu0 (!%p2335_p10), %v3420_v0  ;;  %450 = vadd.xlane.f32.xlu1 (!%p2335_p10), %v3423_v1  ;;  %v3431_v3 = vld [vmem:[%s3393_s17 + $0x18] sm:$0xff] (!%p2335_p10)  ;;  %v3436_v4 = vld [vmem:[%s3393_s17 + $0x20] sm:$0xff] (!%p2335_p10)  ;;  %v3439_v5 = vld [vmem:[%s3393_s17 + $0x28] sm:$0xff] (!%p2335_p10) }
  0x95   : > { %v3444_v6 = vld [vmem:[%s3393_s17 + $0x30] sm:$0xff] (!%p2335_p10)  ;;  %v3447_v7 = vld [vmem:[%s3393_s17 + $0x38] sm:$0xff] (!%p2335_p10)  ;;  %v3452_v8 = vld [vmem:[%s3393_s17 + $0x40] sm:$0xff] (!%p2335_p10)  ;;  %s4347_s10 = sld [smem:[#allocation23_spill]] (!%p2335_p10) }
  0x96   : > { %v3455_v9 = vld [vmem:[%s3393_s17 + $0x48] sm:$0xff] (!%p2335_p10)  ;;  %v3460_v10 = vld [vmem:[%s3393_s17 + $0x50] sm:$0xff] (!%p2335_p10)  ;;  %v3463_v11 = vld [vmem:[%s3393_s17 + $0x58] sm:$0xff] (!%p2335_p10) }
  0x97   : > { %v3468_v12 = vld [vmem:[%s3393_s17 + $0x60] sm:$0xff] (!%p2335_p10)  ;;  %v3471_v13 = vld [vmem:[%s3393_s17 + $0x68] sm:$0xff] (!%p2335_p10)  ;;  %v3476_v14 = vld [vmem:[%s3393_s17 + $0x70] sm:$0xff] (!%p2335_p10) }
  0x98   : > { %448 = vadd.xlane.f32.xlu0 (!%p2335_p10), %v3428_v2  ;;  %452 = vadd.xlane.f32.xlu1 (!%p2335_p10), %v3431_v3  ;;  %v3479_v15 = vld [vmem:[%s3393_s17 + $0x78] sm:$0xff] (!%p2335_p10)  ;;  %v3484_v16 = vld [vmem:[%s3393_s17 + $0x80] sm:$0xff] (!%p2335_p10)  ;;  %v3487_v17 = vld [vmem:[%s3393_s17 + $0x88] sm:$0xff] (!%p2335_p10) }
  0x99   : > { %v3492_v18 = vld [vmem:[%s3393_s17 + $0x90] sm:$0xff] (!%p2335_p10)  ;;  %v3495_v19 = vld [vmem:[%s3393_s17 + $0x98] sm:$0xff] (!%p2335_p10)  ;;  %v3500_v20 = vld [vmem:[%s3393_s17 + $0xa0] sm:$0xff] (!%p2335_p10) }
  0x9a   : > { %v3503_v21 = vld [vmem:[%s3393_s17 + $0xa8] sm:$0xff] (!%p2335_p10)  ;;  %v3508_v22 = vld [vmem:[%s3393_s17 + $0xb0] sm:$0xff] (!%p2335_p10)  ;;  %v3511_v23 = vld [vmem:[%s3393_s17 + $0xb8] sm:$0xff] (!%p2335_p10) }
  0x9b   : > { %v3516_v24 = vld [vmem:[%s3393_s17 + $0xc0] sm:$0xff]  ;;  %v3519_v25 = vld [vmem:[%s3393_s17 + $0xc8] sm:$0xff]  ;;  %v3524_v26 = vld [vmem:[%s3393_s17 + $0xd0] sm:$0xff] }
  0x9c   : > { %454 = vadd.xlane.f32.xlu0 %v3436_v4  ;;  %456 = vadd.xlane.f32.xlu1 %v3439_v5  ;;  %v3527_v27 = vld [vmem:[%s3393_s17 + $0xd8] sm:$0xff]  ;;  %v3532_v28 = vld [vmem:[%s3393_s17 + $0xe0] sm:$0xff]  ;;  %v3535_v29 = vld [vmem:[%s3393_s17 + $0xe8] sm:$0xff] }
  0x9d   : > { %v3540_v30 = vld [vmem:[%s3393_s17 + $0xf0] sm:$0xff]  ;;  %v3543_v31 = vld [vmem:[%s3393_s17 + $0xf8] sm:$0xff] }
  0xa0   : > { %458 = vadd.xlane.f32.xlu0 %v3444_v6  ;;  %460 = vadd.xlane.f32.xlu1 %v3447_v7 }
  0xa4   : > { %462 = vadd.xlane.f32.xlu0 %v3452_v8  ;;  %464 = vadd.xlane.f32.xlu1 %v3455_v9 }
  0xa8   : > { %466 = vadd.xlane.f32.xlu0 %v3460_v10  ;;  %468 = vadd.xlane.f32.xlu1 %v3463_v11 }
  0xac   : > { %470 = vadd.xlane.f32.xlu0 %v3468_v12  ;;  %472 = vadd.xlane.f32.xlu1 %v3471_v13 }
  0xb0   : > { %474 = vadd.xlane.f32.xlu0 %v3476_v14  ;;  %476 = vadd.xlane.f32.xlu1 %v3479_v15 }
  0xb4   : > { %478 = vadd.xlane.f32.xlu0 %v3484_v16  ;;  %480 = vadd.xlane.f32.xlu1 %v3487_v17 }
  0xb8   : > { %482 = vadd.xlane.f32.xlu0 %v3492_v18  ;;  %484 = vadd.xlane.f32.xlu1 %v3495_v19 }
  0xbc   : > { %486 = vadd.xlane.f32.xlu0 %v3500_v20  ;;  %488 = vadd.xlane.f32.xlu1 %v3503_v21 }
  0xc0   : > { %490 = vadd.xlane.f32.xlu0 %v3508_v22  ;;  %492 = vadd.xlane.f32.xlu1 %v3511_v23 }
  0xc4   : > { %494 = vadd.xlane.f32.xlu0 %v3516_v24  ;;  %496 = vadd.xlane.f32.xlu1 %v3519_v25 }
  0xc8   : > { %498 = vadd.xlane.f32.xlu0 %v3524_v26  ;;  %500 = vadd.xlane.f32.xlu1 %v3527_v27 }
  0xcc   : > { %502 = vadd.xlane.f32.xlu0 %v3532_v28  ;;  %504 = vadd.xlane.f32.xlu1 %v3535_v29 }
  0xd0   : > { %506 = vadd.xlane.f32.xlu0 %v3540_v30  ;;  %508 = vadd.xlane.f32.xlu1 %v3543_v31 }
 0x121   : > { %v447_v32 = vpop.xlane.xlu0 %446  ;;  %v451_v33 = vpop.xlane.xlu1 %450 }
 0x122   : > { %v511_v34 = vmul.f32 0.0078125, %v447_v32  ;;  %v513_v35 = vmul.f32 0.0078125, %v451_v33 }
 0x124   : > { %v3548_v36 = vsub.f32 %v3420_v0, %v511_v34  ;;  %v3551_v37 = vsub.f32 %v3423_v1, %v513_v35 }
 0x125   : > { %v449_v38 = vpop.xlane.xlu0 %448  ;;  %v453_v39 = vpop.xlane.xlu1 %452 }
 0x126   : > { %v512_v40 = vmul.f32 0.0078125, %v449_v38  ;;  %v575_v41 = vmul.f32 %v3548_v36, %v3548_v36  ;;  %v514_v42 = vmul.f32 0.0078125, %v453_v39  ;;  %v577_v45 = vmul.f32 %v3551_v37, %v3551_v37 }
 0x128   : > { %v3556_v43 = vsub.f32 %v3428_v2, %v512_v40  ;;  %607 = vadd.xlane.f32.xlu0 %v575_v41  ;;  %v3559_v44 = vsub.f32 %v3431_v3, %v514_v42 }
 0x129   : > { %v455_v46 = vpop.xlane.xlu0 %454  ;;  %v457_v47 = vpop.xlane.xlu1 %456 }
 0x12a   : > { %v515_v48 = vmul.f32 0.0078125, %v455_v46  ;;  %v576_v49 = vmul.f32 %v3556_v43, %v3556_v43  ;;  %v516_v50 = vmul.f32 0.0078125, %v457_v47  ;;  %v578_v53 = vmul.f32 %v3559_v44, %v3559_v44 }
 0x12c   : > { %v3566_v51 = vsub.f32 %v3436_v4, %v515_v48  ;;  %611 = vadd.xlane.f32.xlu0 %v577_v45  ;;  %609 = vadd.xlane.f32.xlu1 %v576_v49  ;;  %v3569_v52 = vsub.f32 %v3439_v5, %v516_v50 }
 0x12d   : > { %v459_v54 = vpop.xlane.xlu0 %458  ;;  %v461_v55 = vpop.xlane.xlu1 %460 }
 0x12e   : > { %v517_v56 = vmul.f32 0.0078125, %v459_v54  ;;  %v579_v57 = vmul.f32 %v3566_v51, %v3566_v51  ;;  %v518_v58 = vmul.f32 0.0078125, %v461_v55  ;;  %v580_v61 = vmul.f32 %v3569_v52, %v3569_v52 }
 0x130   : > { %v3576_v59 = vsub.f32 %v3444_v6, %v517_v56  ;;  %613 = vadd.xlane.f32.xlu1 %v578_v53  ;;  %615 = vadd.xlane.f32.xlu0 %v579_v57  ;;  %v3579_v60 = vsub.f32 %v3447_v7, %v518_v58 }
 0x131   : > { %v463_v62 = vpop.xlane.xlu0 %462  ;;  %v465_v63 = vpop.xlane.xlu1 %464 }
 0x132   : > { %v519_v0 = vmul.f32 0.0078125, %v463_v62  ;;  %v581_v1 = vmul.f32 %v3576_v59, %v3576_v59  ;;  %v520_v2 = vmul.f32 0.0078125, %v465_v63  ;;  %v582_v5 = vmul.f32 %v3579_v60, %v3579_v60 }
 0x134   : > { %v3586_v3 = vsub.f32 %v3452_v8, %v519_v0  ;;  %617 = vadd.xlane.f32.xlu1 %v580_v61  ;;  %619 = vadd.xlane.f32.xlu0 %v581_v1  ;;  %v3589_v4 = vsub.f32 %v3455_v9, %v520_v2 }
 0x135   : > { %v467_v6 = vpop.xlane.xlu0 %466  ;;  %v469_v7 = vpop.xlane.xlu1 %468 }
 0x136   : > { %v521_v32 = vmul.f32 0.0078125, %v467_v6  ;;  %v583_v33 = vmul.f32 %v3586_v3, %v3586_v3  ;;  %v522_v34 = vmul.f32 0.0078125, %v469_v7  ;;  %v584_v9 = vmul.f32 %v3589_v4, %v3589_v4 }
 0x138   : > { %v3596_v35 = vsub.f32 %v3460_v10, %v521_v32  ;;  %621 = vadd.xlane.f32.xlu1 %v582_v5  ;;  %623 = vadd.xlane.f32.xlu0 %v583_v33  ;;  %v3599_v8 = vsub.f32 %v3463_v11, %v522_v34 }
 0x139   : > { %v471_v38 = vpop.xlane.xlu0 %470  ;;  %v473_v39 = vpop.xlane.xlu1 %472 }
 0x13a   : > { %v523_v40 = vmul.f32 0.0078125, %v471_v38  ;;  %v585_v41 = vmul.f32 %v3596_v35, %v3596_v35  ;;  %v524_v42 = vmul.f32 0.0078125, %v473_v39  ;;  %v586_v11 = vmul.f32 %v3599_v8, %v3599_v8 }
 0x13c   : > { %v3606_v45 = vsub.f32 %v3468_v12, %v523_v40  ;;  %625 = vadd.xlane.f32.xlu1 %v584_v9  ;;  %627 = vadd.xlane.f32.xlu0 %v585_v41  ;;  %v3609_v10 = vsub.f32 %v3471_v13, %v524_v42 }
 0x13d   : > { %v475_v46 = vpop.xlane.xlu0 %474  ;;  %v477_v47 = vpop.xlane.xlu1 %476 }
 0x13e   : > { %v525_v48 = vmul.f32 0.0078125, %v475_v46  ;;  %v587_v49 = vmul.f32 %v3606_v45, %v3606_v45  ;;  %v526_v50 = vmul.f32 0.0078125, %v477_v47  ;;  %v588_v13 = vmul.f32 %v3609_v10, %v3609_v10 }
 0x140   : > { %v3616_v53 = vsub.f32 %v3476_v14, %v525_v48  ;;  %629 = vadd.xlane.f32.xlu1 %v586_v11  ;;  %631 = vadd.xlane.f32.xlu0 %v587_v49  ;;  %v3619_v12 = vsub.f32 %v3479_v15, %v526_v50 }
 0x141   : > { %v479_v54 = vpop.xlane.xlu0 %478  ;;  %v481_v55 = vpop.xlane.xlu1 %480 }
 0x142   : > { %v527_v56 = vmul.f32 0.0078125, %v479_v54  ;;  %v589_v57 = vmul.f32 %v3616_v53, %v3616_v53  ;;  %v528_v58 = vmul.f32 0.0078125, %v481_v55  ;;  %v590_v15 = vmul.f32 %v3619_v12, %v3619_v12 }
 0x144   : > { %v3626_v61 = vsub.f32 %v3484_v16, %v527_v56  ;;  %633 = vadd.xlane.f32.xlu1 %v588_v13  ;;  %635 = vadd.xlane.f32.xlu0 %v589_v57  ;;  %v3629_v14 = vsub.f32 %v3487_v17, %v528_v58 }
 0x145   : > { %v483_v62 = vpop.xlane.xlu0 %482  ;;  %v485_v63 = vpop.xlane.xlu1 %484 }
 0x146   : > { %v529_v0 = vmul.f32 0.0078125, %v483_v62  ;;  %v591_v1 = vmul.f32 %v3626_v61, %v3626_v61  ;;  %v530_v2 = vmul.f32 0.0078125, %v485_v63  ;;  %v592_v17 = vmul.f32 %v3629_v14, %v3629_v14 }
 0x148   : > { %v3636_v5 = vsub.f32 %v3492_v18, %v529_v0  ;;  %637 = vadd.xlane.f32.xlu1 %v590_v15  ;;  %639 = vadd.xlane.f32.xlu0 %v591_v1  ;;  %v3639_v16 = vsub.f32 %v3495_v19, %v530_v2 }
 0x149   : > { %v487_v6 = vpop.xlane.xlu0 %486  ;;  %v489_v7 = vpop.xlane.xlu1 %488 }
 0x14a   : > { %v531_v32 = vmul.f32 0.0078125, %v487_v6  ;;  %v593_v33 = vmul.f32 %v3636_v5, %v3636_v5  ;;  %v532_v34 = vmul.f32 0.0078125, %v489_v7  ;;  %v594_v19 = vmul.f32 %v3639_v16, %v3639_v16 }
 0x14c   : > { %v3646_v9 = vsub.f32 %v3500_v20, %v531_v32  ;;  %641 = vadd.xlane.f32.xlu1 %v592_v17  ;;  %643 = vadd.xlane.f32.xlu0 %v593_v33  ;;  %v3649_v18 = vsub.f32 %v3503_v21, %v532_v34 }
 0x14d   : > { %v491_v38 = vpop.xlane.xlu0 %490  ;;  %v493_v39 = vpop.xlane.xlu1 %492 }
 0x14e   : > { %v533_v40 = vmul.f32 0.0078125, %v491_v38  ;;  %v595_v41 = vmul.f32 %v3646_v9, %v3646_v9  ;;  %v534_v42 = vmul.f32 0.0078125, %v493_v39  ;;  %v596_v21 = vmul.f32 %v3649_v18, %v3649_v18 }
 0x150   : > { %v3656_v11 = vsub.f32 %v3508_v22, %v533_v40  ;;  %645 = vadd.xlane.f32.xlu1 %v594_v19  ;;  %647 = vadd.xlane.f32.xlu0 %v595_v41  ;;  %v3659_v20 = vsub.f32 %v3511_v23, %v534_v42  ;;  %v3072_v40 = vmov 0.0  }
 0x151   : > { %v495_v46 = vpop.xlane.xlu0 %494  ;;  %v497_v47 = vpop.xlane.xlu1 %496  ;;  %909 = vst [vmem:[#allocation3] sm:$0xff] %v3072_v40  ;;  %910 = vst [vmem:[#allocation3 + $0x8] sm:$0xff] %v3072_v40 }
 0x152   : > { %v535_v48 = vmul.f32 0.0078125, %v495_v46  ;;  %v597_v49 = vmul.f32 %v3656_v11, %v3656_v11  ;;  %v536_v50 = vmul.f32 0.0078125, %v497_v47  ;;  %v598_v23 = vmul.f32 %v3659_v20, %v3659_v20  ;;  %911 = vst [vmem:[#allocation3 + $0x10] sm:$0xff] %v3072_v40  ;;  %912 = vst [vmem:[#allocation3 + $0x18] sm:$0xff] %v3072_v40 }
 0x153   : > { %913 = vst [vmem:[#allocation3 + $0x20] sm:$0xff] %v3072_v40  ;;  %914 = vst [vmem:[#allocation3 + $0x28] sm:$0xff] %v3072_v40 }
 0x154   : > { %v3666_v13 = vsub.f32 %v3516_v24, %v535_v48  ;;  %649 = vadd.xlane.f32.xlu1 %v596_v21  ;;  %651 = vadd.xlane.f32.xlu0 %v597_v49  ;;  %v3669_v22 = vsub.f32 %v3519_v25, %v536_v50  ;;  %915 = vst [vmem:[#allocation3 + $0x30] sm:$0xff] %v3072_v40  ;;  %916 = vst [vmem:[#allocation3 + $0x38] sm:$0xff] %v3072_v40 }
 0x155   : > { %v499_v54 = vpop.xlane.xlu0 %498  ;;  %v501_v55 = vpop.xlane.xlu1 %500  ;;  %917 = vst [vmem:[#allocation3 + $0x40] sm:$0xff] %v3072_v40  ;;  %918 = vst [vmem:[#allocation3 + $0x48] sm:$0xff] %v3072_v40 }
 0x156   : > { %v537_v56 = vmul.f32 0.0078125, %v499_v54  ;;  %v599_v57 = vmul.f32 %v3666_v13, %v3666_v13  ;;  %v538_v58 = vmul.f32 0.0078125, %v501_v55  ;;  %v600_v25 = vmul.f32 %v3669_v22, %v3669_v22  ;;  %919 = vst [vmem:[#allocation3 + $0x50] sm:$0xff] %v3072_v40  ;;  %920 = vst [vmem:[#allocation3 + $0x58] sm:$0xff] %v3072_v40 }
 0x157   : > { %921 = vst [vmem:[#allocation3 + $0x60] sm:$0xff] %v3072_v40  ;;  %922 = vst [vmem:[#allocation3 + $0x68] sm:$0xff] %v3072_v40 }
 0x158   : > { %v3676_v15 = vsub.f32 %v3524_v26, %v537_v56  ;;  %653 = vadd.xlane.f32.xlu1 %v598_v23  ;;  %655 = vadd.xlane.f32.xlu0 %v599_v57  ;;  %v3679_v24 = vsub.f32 %v3527_v27, %v538_v58  ;;  %923 = vst [vmem:[#allocation3 + $0x70] sm:$0xff] %v3072_v40  ;;  %924 = vst [vmem:[#allocation3 + $0x78] sm:$0xff] %v3072_v40 }
 0x159   : > { %v503_v62 = vpop.xlane.xlu0 %502  ;;  %v505_v63 = vpop.xlane.xlu1 %504  ;;  %925 = vst [vmem:[#allocation3 + $0x80] sm:$0xff] %v3072_v40  ;;  %926 = vst [vmem:[#allocation3 + $0x88] sm:$0xff] %v3072_v40 }
 0x15a   : > { %v539_v0 = vmul.f32 0.0078125, %v503_v62  ;;  %v601_v1 = vmul.f32 %v3676_v15, %v3676_v15  ;;  %v540_v2 = vmul.f32 0.0078125, %v505_v63  ;;  %v602_v27 = vmul.f32 %v3679_v24, %v3679_v24  ;;  %927 = vst [vmem:[#allocation3 + $0x90] sm:$0xff] %v3072_v40  ;;  %928 = vst [vmem:[#allocation3 + $0x98] sm:$0xff] %v3072_v40 }
 0x15b   : > { %929 = vst [vmem:[#allocation3 + $0xa0] sm:$0xff] %v3072_v40  ;;  %930 = vst [vmem:[#allocation3 + $0xa8] sm:$0xff] %v3072_v40 }
 0x15c   : > { %v3686_v17 = vsub.f32 %v3532_v28, %v539_v0  ;;  %657 = vadd.xlane.f32.xlu1 %v600_v25  ;;  %659 = vadd.xlane.f32.xlu0 %v601_v1  ;;  %v3689_v26 = vsub.f32 %v3535_v29, %v540_v2  ;;  %931 = vst [vmem:[#allocation3 + $0xb0] sm:$0xff] %v3072_v40  ;;  %932 = vst [vmem:[#allocation3 + $0xb8] sm:$0xff] %v3072_v40 }
 0x15d   : > { %v507_v6 = vpop.xlane.xlu0 %506  ;;  %v509_v7 = vpop.xlane.xlu1 %508  ;;  %933 = vst [vmem:[#allocation3 + $0xc0] sm:$0xff] %v3072_v40  ;;  %934 = vst [vmem:[#allocation3 + $0xc8] sm:$0xff] %v3072_v40 }
 0x15e   : > { %v541_v32 = vmul.f32 0.0078125, %v507_v6  ;;  %v603_v33 = vmul.f32 %v3686_v17, %v3686_v17  ;;  %v542_v34 = vmul.f32 0.0078125, %v509_v7  ;;  %v604_v29 = vmul.f32 %v3689_v26, %v3689_v26  ;;  %935 = vst [vmem:[#allocation3 + $0xd0] sm:$0xff] %v3072_v40  ;;  %936 = vst [vmem:[#allocation3 + $0xd8] sm:$0xff] %v3072_v40 }
 0x15f   : > { %937 = vst [vmem:[#allocation3 + $0xe0] sm:$0xff] %v3072_v40  ;;  %938 = vst [vmem:[#allocation3 + $0xe8] sm:$0xff] %v3072_v40 }
 0x160   : > { %v3696_v19 = vsub.f32 %v3540_v30, %v541_v32  ;;  %661 = vadd.xlane.f32.xlu1 %v602_v27  ;;  %663 = vadd.xlane.f32.xlu0 %v603_v33  ;;  %v3699_v28 = vsub.f32 %v3543_v31, %v542_v34  ;;  %939 = vst [vmem:[#allocation3 + $0xf0] sm:$0xff] %v3072_v40  ;;  %940 = vst [vmem:[#allocation3 + $0xf8] sm:$0xff] %v3072_v40  ;;  %v3711_v32 = vld [vmem:[%s4346_s26] ss:$0 sm:$0xff] }
 0x162   : > { %v605_v38 = vmul.f32 %v3696_v19, %v3696_v19  ;;  %v606_v39 = vmul.f32 %v3699_v28, %v3699_v28 }
 0x164   : > { %665 = vadd.xlane.f32.xlu1 %v604_v29  ;;  %667 = vadd.xlane.f32.xlu0 %v605_v38 }
 0x168   : > { %669 = vadd.xlane.f32.xlu1 %v606_v39 }
 0x1b5   : > { %v608_v30 = vpop.xlane.xlu0 %607 }
 0x1b6   : > { %v671_v31 = vmul.f32 0.0078125, %v608_v30 }
 0x1b8   : > { %v703_v41 = vadd.f32 1e-05, %v671_v31 }
 0x1b9   : > { %v610_v42 = vpop.xlane.xlu1 %609  ;;  %v612_v21 = vpop.xlane.xlu0 %611 }
 0x1ba   : > { %2614 = vrsqrt.f32 %v703_v41  ;;  %v672_v46 = vmul.f32 0.0078125, %v610_v42  ;;  %v673_v47 = vmul.f32 0.0078125, %v612_v21  ;;  %v3718_v42 = vld [vmem:[%s4347_s10] ss:$0 sm:$0xff] }
 0x1bc   : > { %v704_v48 = vadd.f32 1e-05, %v672_v46  ;;  %v705_v49 = vadd.f32 1e-05, %v673_v47 }
 0x1bd   : > { %v614_v50 = vpop.xlane.xlu1 %613  ;;  %v616_v23 = vpop.xlane.xlu0 %615 }
 0x1be   : > { %2616 = vrsqrt.f32 %v704_v48  ;;  %v674_v54 = vmul.f32 0.0078125, %v614_v50  ;;  %v675_v55 = vmul.f32 0.0078125, %v616_v23 }
 0x1bf   : > { %2618 = vrsqrt.f32 %v705_v49 }
 0x1c0   : > { %v706_v56 = vadd.f32 1e-05, %v674_v54  ;;  %v707_v57 = vadd.f32 1e-05, %v675_v55 }
 0x1c1   : > { %v618_v58 = vpop.xlane.xlu1 %617  ;;  %v620_v25 = vpop.xlane.xlu0 %619 }
 0x1c2   : > { %2620 = vrsqrt.f32 %v706_v56  ;;  %v676_v62 = vmul.f32 0.0078125, %v618_v58  ;;  %v677_v63 = vmul.f32 0.0078125, %v620_v25 }
 0x1c3   : > { %2622 = vrsqrt.f32 %v707_v57 }
 0x1c4   : > { %v2615_v0 = vpop.eup %2614  ;;  %v708_v1 = vadd.f32 1e-05, %v676_v62  ;;  %v709_v2 = vadd.f32 1e-05, %v677_v63 }
 0x1c5   : > { %v767_v27 = vmul.f32 %v2615_v0, %v3548_v36  ;;  %v622_v6 = vpop.xlane.xlu1 %621  ;;  %v624_v7 = vpop.xlane.xlu0 %623 }
 0x1c6   : > { %2624 = vrsqrt.f32 %v708_v1  ;;  %v678_v33 = vmul.f32 0.0078125, %v622_v6  ;;  %v679_v34 = vmul.f32 0.0078125, %v624_v7 }
 0x1c7   : > { %2626 = vrsqrt.f32 %v709_v2  ;;  %v806_v30 = vmul.f32 %v3711_v32, %v767_v27 }
 0x1c8   : > { %v2617_v29 = vpop.eup %2616  ;;  %v710_v38 = vadd.f32 1e-05, %v678_v33  ;;  %v711_v39 = vadd.f32 1e-05, %v679_v34 }
 0x1c9   : > { %v2619_v40 = vpop.eup %2618  ;;  %v768_v31 = vmul.f32 %v2617_v29, %v3556_v43  ;;  %v626_v36 = vpop.xlane.xlu1 %625  ;;  %v845_v43 = vadd.f32 %v3718_v42, %v806_v30 }
 0x1ca   : > { %v628_v41 = vpop.xlane.xlu0 %627  ;;  %v769_v21 = vmul.f32 %v2619_v40, %v3551_v37  ;;  %2628 = vrsqrt.f32 %v710_v38  ;;  %v680_v46 = vmul.f32 0.0078125, %v626_v36 }
 0x1cb   : > { %v681_v47 = vmul.f32 0.0078125, %v628_v41  ;;  %v807_v48 = vmul.f32 %v3711_v32, %v768_v31  ;;  %2630 = vrsqrt.f32 %v711_v39 }
 0x1cc   : > { %v2621_v49 = vpop.eup %2620  ;;  %v712_v50 = vadd.f32 1e-05, %v680_v46  ;;  %v808_v56 = vmul.f32 %v3711_v32, %v769_v21 }
 0x1cd   : > { %v713_v23 = vadd.f32 1e-05, %v681_v47  ;;  %v2623_v54 = vpop.eup %2622  ;;  %v846_v55 = vadd.f32 %v3718_v42, %v807_v48  ;;  %v770_v57 = vmul.f32 %v2621_v49, %v3559_v44  ;;  %v630_v58 = vpop.xlane.xlu1 %629 }
 0x1ce   : > { %v632_v37 = vpop.xlane.xlu0 %631  ;;  %v771_v25 = vmul.f32 %v2623_v54, %v3566_v51  ;;  %2632 = vrsqrt.f32 %v712_v50  ;;  %v682_v62 = vmul.f32 0.0078125, %v630_v58  ;;  %v847_v33 = vadd.f32 %v3718_v42, %v808_v56 }
 0x1cf   : > { %v877_v63 = vpack.c.bf16 %v846_v55, %v845_v43  ;;  %v809_v0 = vmul.f32 %v3711_v32, %v770_v57  ;;  %2634 = vrsqrt.f32 %v713_v23  ;;  %v683_v1 = vmul.f32 0.0078125, %v632_v37 }
 0x1d0   : > { %v2625_v2 = vpop.eup %2624  ;;  %v810_v27 = vmul.f32 %v3711_v32, %v771_v25  ;;  %v714_v6 = vadd.f32 1e-05, %v682_v62 }
 0x1d1   : > { %v2627_v7 = vpop.eup %2626  ;;  %893 = vst [vmem:[#allocation2] sm:$0xff] %v877_v63  ;;  %v848_v44 = vadd.f32 %v3718_v42, %v809_v0  ;;  %v772_v34 = vmul.f32 %v2625_v2, %v3569_v52  ;;  %v715_v51 = vadd.f32 1e-05, %v683_v1  ;;  %v634_v29 = vpop.xlane.xlu1 %633 }
 0x1d2   : > { %v636_v38 = vpop.xlane.xlu0 %635  ;;  %v773_v39 = vmul.f32 %v2627_v7, %v3576_v59  ;;  %2636 = vrsqrt.f32 %v714_v6  ;;  %v684_v40 = vmul.f32 0.0078125, %v634_v29  ;;  %v849_v21 = vadd.f32 %v3718_v42, %v810_v27 }
 0x1d3   : > { %v878_v30 = vpack.c.bf16 %v848_v44, %v847_v33  ;;  %v811_v31 = vmul.f32 %v3711_v32, %v772_v34  ;;  %2638 = vrsqrt.f32 %v715_v51  ;;  %v685_v36 = vmul.f32 0.0078125, %v636_v38 }
 0x1d4   : > { %v2629_v41 = vpop.eup %2628  ;;  %v716_v46 = vadd.f32 1e-05, %v684_v40  ;;  %v812_v48 = vmul.f32 %v3711_v32, %v773_v39 }
 0x1d5   : > { %v2631_v47 = vpop.eup %2630  ;;  %894 = vst [vmem:[#allocation2 + $0x8] sm:$0xff] %v878_v30  ;;  %v850_v52 = vadd.f32 %v3718_v42, %v811_v31  ;;  %v774_v49 = vmul.f32 %v2629_v41, %v3579_v60  ;;  %v717_v59 = vadd.f32 1e-05, %v685_v36  ;;  %v638_v50 = vpop.xlane.xlu1 %637 }
 0x1d6   : > { %v640_v23 = vpop.xlane.xlu0 %639  ;;  %v775_v54 = vmul.f32 %v2631_v47, %v3586_v3  ;;  %2640 = vrsqrt.f32 %v716_v46  ;;  %v686_v43 = vmul.f32 0.0078125, %v638_v50  ;;  %v851_v60 = vadd.f32 %v3718_v42, %v812_v48 }
 0x1d7   : > { %v879_v55 = vpack.c.bf16 %v850_v52, %v849_v21  ;;  %v813_v56 = vmul.f32 %v3711_v32, %v774_v49  ;;  %2642 = vrsqrt.f32 %v717_v59  ;;  %v687_v57 = vmul.f32 0.0078125, %v640_v23 }
 0x1d8   : > { %v2633_v58 = vpop.eup %2632  ;;  %v814_v37 = vmul.f32 %v3711_v32, %v775_v54  ;;  %v718_v25 = vadd.f32 1e-05, %v686_v43 }
 0x1d9   : > { %v2635_v62 = vpop.eup %2634  ;;  %895 = vst [vmem:[#allocation2 + $0x10] sm:$0xff] %v879_v55  ;;  %v852_v63 = vadd.f32 %v3718_v42, %v813_v56  ;;  %v776_v0 = vmul.f32 %v2633_v58, %v3589_v4  ;;  %v719_v3 = vadd.f32 1e-05, %v687_v57  ;;  %v642_v1 = vpop.xlane.xlu1 %641 }
 0x1da   : > { %v644_v2 = vpop.xlane.xlu0 %643  ;;  %v777_v27 = vmul.f32 %v2635_v62, %v3596_v35  ;;  %2644 = vrsqrt.f32 %v718_v25  ;;  %v688_v6 = vmul.f32 0.0078125, %v642_v1  ;;  %v853_v51 = vadd.f32 %v3718_v42, %v814_v37 }
 0x1db   : > { %v880_v7 = vpack.c.bf16 %v852_v63, %v851_v60  ;;  %v815_v33 = vmul.f32 %v3711_v32, %v776_v0  ;;  %2646 = vrsqrt.f32 %v719_v3  ;;  %v689_v44 = vmul.f32 0.0078125, %v644_v2 }
 0x1dc   : > { %v2637_v34 = vpop.eup %2636  ;;  %v720_v29 = vadd.f32 1e-05, %v688_v6  ;;  %v816_v39 = vmul.f32 %v3711_v32, %v777_v27 }
 0x1dd   : > { %v2639_v38 = vpop.eup %2638  ;;  %896 = vst [vmem:[#allocation2 + $0x18] sm:$0xff] %v880_v7  ;;  %v854_v4 = vadd.f32 %v3718_v42, %v815_v33  ;;  %v778_v40 = vmul.f32 %v2637_v34, %v3599_v8  ;;  %v721_v35 = vadd.f32 1e-05, %v689_v44  ;;  %v646_v30 = vpop.xlane.xlu1 %645 }
 0x1de   : > { %v648_v31 = vpop.xlane.xlu0 %647  ;;  %v779_v36 = vmul.f32 %v2639_v38, %v3606_v45  ;;  %2648 = vrsqrt.f32 %v720_v29  ;;  %v690_v41 = vmul.f32 0.0078125, %v646_v30  ;;  %v855_v8 = vadd.f32 %v3718_v42, %v816_v39 }
 0x1df   : > { %v881_v21 = vpack.c.bf16 %v854_v4, %v853_v51  ;;  %v817_v46 = vmul.f32 %v3711_v32, %v778_v40  ;;  %2650 = vrsqrt.f32 %v721_v35  ;;  %v691_v47 = vmul.f32 0.0078125, %v648_v31 }
 0x1e0   : > { %v2641_v52 = vpop.eup %2640  ;;  %v818_v48 = vmul.f32 %v3711_v32, %v779_v36  ;;  %v722_v49 = vadd.f32 1e-05, %v690_v41 }
 0x1e1   : > { %v2643_v59 = vpop.eup %2642  ;;  %897 = vst [vmem:[#allocation2 + $0x20] sm:$0xff] %v881_v21  ;;  %v856_v50 = vadd.f32 %v3718_v42, %v817_v46  ;;  %v780_v23 = vmul.f32 %v2641_v52, %v3609_v10  ;;  %v723_v45 = vadd.f32 1e-05, %v691_v47  ;;  %v650_v54 = vpop.xlane.xlu1 %649 }
 0x1e2   : > { %v652_v43 = vpop.xlane.xlu0 %651  ;;  %v781_v55 = vmul.f32 %v2643_v59, %v3616_v53  ;;  %2652 = vrsqrt.f32 %v722_v49  ;;  %v692_v56 = vmul.f32 0.0078125, %v650_v54  ;;  %v857_v62 = vadd.f32 %v3718_v42, %v818_v48 }
 0x1e3   : > { %v882_v57 = vpack.c.bf16 %v856_v50, %v855_v8  ;;  %v819_v58 = vmul.f32 %v3711_v32, %v780_v23  ;;  %2654 = vrsqrt.f32 %v723_v45  ;;  %v693_v37 = vmul.f32 0.0078125, %v652_v43 }
 0x1e4   : > { %v2645_v25 = vpop.eup %2644  ;;  %v724_v60 = vadd.f32 1e-05, %v692_v56  ;;  %v820_v0 = vmul.f32 %v3711_v32, %v781_v55 }
 0x1e5   : > { %v2647_v63 = vpop.eup %2646  ;;  %898 = vst [vmem:[#allocation2 + $0x28] sm:$0xff] %v882_v57  ;;  %v858_v10 = vadd.f32 %v3718_v42, %v819_v58  ;;  %v782_v3 = vmul.f32 %v2645_v25, %v3619_v12  ;;  %v725_v53 = vadd.f32 1e-05, %v693_v37  ;;  %v654_v1 = vpop.xlane.xlu1 %653 }
 0x1e6   : > { %v656_v2 = vpop.xlane.xlu0 %655  ;;  %v783_v27 = vmul.f32 %v2647_v63, %v3626_v61  ;;  %2656 = vrsqrt.f32 %v724_v60  ;;  %v694_v6 = vmul.f32 0.0078125, %v654_v1  ;;  %v859_v12 = vadd.f32 %v3718_v42, %v820_v0 }
 0x1e7   : > { %v883_v7 = vpack.c.bf16 %v858_v10, %v857_v62  ;;  %v821_v33 = vmul.f32 %v3711_v32, %v782_v3  ;;  %2658 = vrsqrt.f32 %v725_v53  ;;  %v695_v44 = vmul.f32 0.0078125, %v656_v2 }
 0x1e8   : > { %v2649_v34 = vpop.eup %2648  ;;  %v822_v51 = vmul.f32 %v3711_v32, %v783_v27  ;;  %v726_v29 = vadd.f32 1e-05, %v694_v6 }
 0x1e9   : > { %v2651_v38 = vpop.eup %2650  ;;  %899 = vst [vmem:[#allocation2 + $0x30] sm:$0xff] %v883_v7  ;;  %v860_v4 = vadd.f32 %v3718_v42, %v821_v33  ;;  %v784_v39 = vmul.f32 %v2649_v34, %v3629_v14  ;;  %v727_v61 = vadd.f32 1e-05, %v695_v44  ;;  %v658_v40 = vpop.xlane.xlu1 %657 }
 0x1ea   : > { %v660_v35 = vpop.xlane.xlu0 %659  ;;  %v785_v30 = vmul.f32 %v2651_v38, %v3636_v5  ;;  %2660 = vrsqrt.f32 %v726_v29  ;;  %v696_v31 = vmul.f32 0.0078125, %v658_v40  ;;  %v861_v47 = vadd.f32 %v3718_v42, %v822_v51 }
 0x1eb   : > { %v884_v36 = vpack.c.bf16 %v860_v4, %v859_v12  ;;  %v823_v41 = vmul.f32 %v3711_v32, %v784_v39  ;;  %2662 = vrsqrt.f32 %v727_v61  ;;  %v697_v21 = vmul.f32 0.0078125, %v660_v35 }
 0x1ec   : > { %v2653_v46 = vpop.eup %2652  ;;  %v728_v52 = vadd.f32 1e-05, %v696_v31  ;;  %v824_v49 = vmul.f32 %v3711_v32, %v785_v30 }
 0x1ed   : > { %v2655_v48 = vpop.eup %2654  ;;  %900 = vst [vmem:[#allocation2 + $0x38] sm:$0xff] %v884_v36  ;;  %v862_v14 = vadd.f32 %v3718_v42, %v823_v41  ;;  %v786_v59 = vmul.f32 %v2653_v46, %v3639_v16  ;;  %v729_v5 = vadd.f32 1e-05, %v697_v21  ;;  %v662_v8 = vpop.xlane.xlu1 %661 }
 0x1ee   : > { %v664_v50 = vpop.xlane.xlu0 %663  ;;  %v787_v23 = vmul.f32 %v2655_v48, %v3646_v9  ;;  %2664 = vrsqrt.f32 %v728_v52  ;;  %v698_v45 = vmul.f32 0.0078125, %v662_v8  ;;  %v863_v16 = vadd.f32 %v3718_v42, %v824_v49 }
 0x1ef   : > { %v885_v54 = vpack.c.bf16 %v862_v14, %v861_v47  ;;  %v825_v43 = vmul.f32 %v3711_v32, %v786_v59  ;;  %2666 = vrsqrt.f32 %v729_v5  ;;  %v699_v55 = vmul.f32 0.0078125, %v664_v50 }
 0x1f0   : > { %v2657_v56 = vpop.eup %2656  ;;  %v826_v57 = vmul.f32 %v3711_v32, %v787_v23  ;;  %v730_v58 = vadd.f32 1e-05, %v698_v45 }
 0x1f1   : > { %v2659_v37 = vpop.eup %2658  ;;  %901 = vst [vmem:[#allocation2 + $0x40] sm:$0xff] %v885_v54  ;;  %v864_v25 = vadd.f32 %v3718_v42, %v825_v43  ;;  %v788_v62 = vmul.f32 %v2657_v56, %v3649_v18  ;;  %v731_v9 = vadd.f32 1e-05, %v699_v55  ;;  %v666_v60 = vpop.xlane.xlu1 %665 }
 0x1f2   : > { %v668_v63 = vpop.xlane.xlu0 %667  ;;  %v789_v10 = vmul.f32 %v2659_v37, %v3656_v11  ;;  %2668 = vrsqrt.f32 %v730_v58  ;;  %v700_v0 = vmul.f32 0.0078125, %v666_v60  ;;  %v865_v27 = vadd.f32 %v3718_v42, %v826_v57 }
 0x1f3   : > { %v886_v3 = vpack.c.bf16 %v864_v25, %v863_v16  ;;  %v827_v53 = vmul.f32 %v3711_v32, %v788_v62  ;;  %2670 = vrsqrt.f32 %v731_v9  ;;  %v701_v1 = vmul.f32 0.0078125, %v668_v63 }
 0x1f4   : > { %v2661_v2 = vpop.eup %2660  ;;  %v732_v6 = vadd.f32 1e-05, %v700_v0  ;;  %v828_v33 = vmul.f32 %v3711_v32, %v789_v10 }
 0x1f5   : > { %v2663_v7 = vpop.eup %2662  ;;  %902 = vst [vmem:[#allocation2 + $0x48] sm:$0xff] %v886_v3  ;;  %v866_v18 = vadd.f32 %v3718_v42, %v827_v53  ;;  %v790_v44 = vmul.f32 %v2661_v2, %v3659_v20  ;;  %v733_v11 = vadd.f32 1e-05, %v701_v1  ;;  %v670_v34 = vpop.xlane.xlu1 %669 }
 0x1f6   : > { %v791_v51 = vmul.f32 %v2663_v7, %v3666_v13  ;;  %2672 = vrsqrt.f32 %v732_v6  ;;  %v702_v29 = vmul.f32 0.0078125, %v670_v34  ;;  %v867_v40 = vadd.f32 %v3718_v42, %v828_v33 }
 0x1f7   : > { %v887_v38 = vpack.c.bf16 %v866_v18, %v865_v27  ;;  %v829_v12 = vmul.f32 %v3711_v32, %v790_v44  ;;  %2674 = vrsqrt.f32 %v733_v11 }
 0x1f8   : > { %v2665_v4 = vpop.eup %2664  ;;  %v734_v39 = vadd.f32 1e-05, %v702_v29  ;;  %v830_v20 = vmul.f32 %v3711_v32, %v791_v51 }
 0x1f9   : > { %v2667_v61 = vpop.eup %2666  ;;  %903 = vst [vmem:[#allocation2 + $0x50] sm:$0xff] %v887_v38  ;;  %v868_v35 = vadd.f32 %v3718_v42, %v829_v12  ;;  %v792_v30 = vmul.f32 %v2665_v4, %v3669_v22 }
 0x1fa   : > { %v793_v13 = vmul.f32 %v2667_v61, %v3676_v15  ;;  %2676 = vrsqrt.f32 %v734_v39  ;;  %v869_v46 = vadd.f32 %v3718_v42, %v830_v20 }
 0x1fb   : > { %v888_v31 = vpack.c.bf16 %v868_v35, %v867_v40  ;;  %v831_v36 = vmul.f32 %v3711_v32, %v792_v30 }
 0x1fc   : > { %v2669_v41 = vpop.eup %2668  ;;  %v832_v52 = vmul.f32 %v3711_v32, %v793_v13 }
 0x1fd   : > { %v2671_v21 = vpop.eup %2670  ;;  %904 = vst [vmem:[#allocation2 + $0x58] sm:$0xff] %v888_v31  ;;  %v870_v47 = vadd.f32 %v3718_v42, %v831_v36  ;;  %v794_v48 = vmul.f32 %v2669_v41, %v3679_v24 }
 0x1fe   : > { %v795_v14 = vmul.f32 %v2671_v21, %v3686_v17  ;;  %v871_v5 = vadd.f32 %v3718_v42, %v832_v52 }
 0x1ff   : > { %v889_v22 = vpack.c.bf16 %v870_v47, %v869_v46  ;;  %v833_v15 = vmul.f32 %v3711_v32, %v794_v48 }
 0x200   : > { %v2673_v49 = vpop.eup %2672  ;;  %v834_v50 = vmul.f32 %v3711_v32, %v795_v14 }
 0x201   : > { %v2675_v59 = vpop.eup %2674  ;;  %905 = vst [vmem:[#allocation2 + $0x60] sm:$0xff] %v889_v22  ;;  %v872_v8 = vadd.f32 %v3718_v42, %v833_v15  ;;  %v796_v23 = vmul.f32 %v2673_v49, %v3689_v26 }
 0x202   : > { %v797_v45 = vmul.f32 %v2675_v59, %v3696_v19  ;;  %v873_v43 = vadd.f32 %v3718_v42, %v834_v50 }
 0x203   : > { %v890_v54 = vpack.c.bf16 %v872_v8, %v871_v5  ;;  %v835_v24 = vmul.f32 %v3711_v32, %v796_v23 }
 0x204   : > { %v2677_v17 = vpop.eup %2676  ;;  %v836_v56 = vmul.f32 %v3711_v32, %v797_v45 }
 0x205   : > { %906 = vst [vmem:[#allocation2 + $0x68] sm:$0xff] %v890_v54  ;;  %v874_v55 = vadd.f32 %v3718_v42, %v835_v24  ;;  %v798_v57 = vmul.f32 %v2677_v17, %v3699_v28 }
 0x206   : > { %v875_v26 = vadd.f32 %v3718_v42, %v836_v56 }
 0x207   : > { %v891_v58 = vpack.c.bf16 %v874_v55, %v873_v43  ;;  %v837_v37 = vmul.f32 %v3711_v32, %v798_v57 }
 0x209   : > { %907 = vst [vmem:[#allocation2 + $0x70] sm:$0xff] %v891_v58  ;;  %v876_v19 = vadd.f32 %v3718_v42, %v837_v37 }
 0x20b   : > { %v892_v16 = vpack.c.bf16 %v876_v19, %v875_v26 }
 0x20d   : > { %908 = vst [vmem:[#allocation2 + $0x78] sm:$0xff] %v892_v16 }
 0x20e PF: > { %v2678_v28 = vld [vmem:[%s3401_s20 + $0x4] ss:$8 sps:$4 sm:$0xff]   ;;  %v2680_v25 = vld [vmem:[%s3401_s20] ss:$8 sps:$4 sm:$0xff]   ;;  %v3073_v32 = vmov 0   ;;  %v943_v29 = vld [vmem:[#allocation2 + $0x10] sm:$0xff]  ;;  %v975_v50 = vlaneseq }
 0x20f   : > { %1097 = vmatprep.mubr.bf16.mxu0 %v3073_v32  ;;  %1065 = vmatprep.subr.bf16.mxu0 %v2678_v28  ;;  %v2681_v42 = vld [vmem:[%s3401_s20 + $0x14] ss:$8 sps:$4 sm:$0xff]   ;;  %v2683_v62 = vld [vmem:[%s3401_s20 + $0x10] ss:$8 sps:$4 sm:$0xff]   ;;  %v2684_v9 = vld [vmem:[%s3401_s20 + $0x24] ss:$8 sps:$4 sm:$0xff]  }
 0x210   : > { %1066 = vmatpush1.bf16.msra.mxu0 %v2680_v25  ;;  %v2686_v60 = vld [vmem:[%s3401_s20 + $0x20] ss:$8 sps:$4 sm:$0xff]   ;;  %v2687_v63 = vld [vmem:[%s3401_s20 + $0x34] ss:$8 sps:$4 sm:$0xff]   ;;  %v2689_v10 = vld [vmem:[%s3401_s20 + $0x30] ss:$8 sps:$4 sm:$0xff]  }
 0x211   : > { %1067 = vmatprep.subr.bf16.mxu0 %v2681_v42  ;;  %v2690_v0 = vld [vmem:[%s3401_s20 + $0x44] ss:$8 sps:$4 sm:$0xff]   ;;  %v2692_v3 = vld [vmem:[%s3401_s20 + $0x40] ss:$8 sps:$4 sm:$0xff]   ;;  %v2693_v53 = vld [vmem:[%s3401_s20 + $0x54] ss:$8 sps:$4 sm:$0xff]  }
 0x212   : > { %v2695_v1 = vld [vmem:[%s3401_s20 + $0x50] ss:$8 sps:$4 sm:$0xff]   ;;  %v2696_v2 = vld [vmem:[%s3401_s20 + $0x64] ss:$8 sps:$4 sm:$0xff]   ;;  %v2698_v27 = vld [vmem:[%s3401_s20 + $0x60] ss:$8 sps:$4 sm:$0xff]  }
 0x213   : > { %v2699_v6 = vld [vmem:[%s3401_s20 + $0x74] ss:$8 sps:$4 sm:$0xff]   ;;  %v2702_v7 = vld [vmem:[%s3414_s8 + $0x40] sm:$0xff]   ;;  %v2704_v33 = vld [vmem:[%s3414_s8 + $0x48] sm:$0xff]   ;;  %v976_v23 = vshrl.u32 %v975_v50, 7  ;;  %p2370_p2 = scmp.ne.s32.totalorder %s3046_s30, 1 }
 0x214   : > { %1068 = vmatpush1.bf16.msra.mxu0 %v2683_v62  ;;  %v2703_v18 = vld [vmem:[%s3414_s8] sm:$0xff]   ;;  %v2701_v44 = vld [vmem:[%s3401_s20 + $0x70] ss:$8 sps:$4 sm:$0xff]   ;;  %2381 = vmatprep.subr.bf16.mxu1 %v2702_v7  ;;  %v2705_v11 = vld [vmem:[%s3414_s8 + $0x8] sm:$0xff]   ;;  %s4348_s7 = sld [smem:[#allocation25_spill]] (!%p2370_p2) }
 0x215   : > { %1069 = vmatprep.subr.bf16.mxu0 %v2684_v9  ;;  %2382 = vmatpush3.bf16.msra.mxu1 %v2703_v18  ;;  %v941_v34 = vld [vmem:[#allocation2] sm:$0xff]  ;;  %v942_v51 = vld [vmem:[#allocation2 + $0x8] sm:$0xff]  ;;  %v944_v38 = vld [vmem:[#allocation2 + $0x18] sm:$0xff]  ;;  %v977_v45 = vsub.s32 0, %v976_v23  ;;  %v981_v24 = vsub.s32 1, %v976_v23 }
 0x216   : > { %2383 = vmatprep.subr.bf16.mxu1 %v2704_v33  ;;  %v945_v12 = vld [vmem:[#allocation2 + $0x20] sm:$0xff]  ;;  %v946_v4 = vld [vmem:[#allocation2 + $0x28] sm:$0xff]  ;;  %v947_v39 = vld [vmem:[#allocation2 + $0x30] sm:$0xff] }
 0x217   : > { %v948_v61 = vld [vmem:[#allocation2 + $0x38] sm:$0xff]  ;;  %v949_v40 = vld [vmem:[#allocation2 + $0x40] sm:$0xff]  ;;  %v950_v35 = vld [vmem:[#allocation2 + $0x48] sm:$0xff] }
 0x218   : > { %1070 = vmatpush1.bf16.msra.mxu0 %v2686_v60  ;;  %v951_v20 = vld [vmem:[#allocation2 + $0x50] sm:$0xff]  ;;  %v952_v31 = vld [vmem:[#allocation2 + $0x58] sm:$0xff]  ;;  %v2710_v21 = vld [vmem:[%s3414_s8 + $0x60] sm:$0xff]  }
 0x219   : > { %1071 = vmatprep.subr.bf16.mxu0 %v2687_v63  ;;  %2384 = vmatpush3.bf16.msra.mxu1 %v2705_v11  ;;  %v2706_v30 = vld [vmem:[%s3414_s8 + $0x50] sm:$0xff]   ;;  %v2708_v36 = vld [vmem:[%s3414_s8 + $0x58] sm:$0xff]   ;;  %v2711_v46 = vld [vmem:[%s3414_s8 + $0x20] sm:$0xff]  }
 0x21a   : > { %v2707_v13 = vld [vmem:[%s3414_s8 + $0x10] sm:$0xff]   ;;  %2385 = vmatprep.subr.bf16.mxu1 %v2706_v30  ;;  %v2709_v41 = vld [vmem:[%s3414_s8 + $0x18] sm:$0xff]   ;;  %v953_v47 = vld [vmem:[#allocation2 + $0x60] sm:$0xff] }
 0x21b   : > { %v2712_v52 = vld [vmem:[%s3414_s8 + $0x68] sm:$0xff]   ;;  %v2714_v14 = vld [vmem:[%s3414_s8 + $0x70] sm:$0xff]   ;;  %v2716_v49 = vld [vmem:[%s3414_s8 + $0x78] sm:$0xff]  }
 0x21c   : > { %1072 = vmatpush1.bf16.msra.mxu0 %v2689_v10  ;;  %v2713_v48 = vld [vmem:[%s3414_s8 + $0x28] sm:$0xff]   ;;  %v2715_v22 = vld [vmem:[%s3414_s8 + $0x30] sm:$0xff]   ;;  %v2717_v59 = vld [vmem:[%s3414_s8 + $0x38] sm:$0xff]  }
 0x21d   : > { %1073 = vmatprep.subr.bf16.mxu0 %v2690_v0  ;;  %2386 = vmatpush3.bf16.msra.mxu1 %v2707_v13  ;;  %v954_v15 = vld [vmem:[#allocation2 + $0x68] sm:$0xff]  ;;  %v955_v5 = vld [vmem:[#allocation2 + $0x70] sm:$0xff]  ;;  %v956_v8 = vld [vmem:[#allocation2 + $0x78] sm:$0xff] }
 0x21e   : > { %2387 = vmatprep.subr.bf16.mxu1 %v2708_v36  ;;  %v973_v54 = vld [vmem:[%s405_s12] sm:$0x3] }
 0x21f   : > { %v3866_v17 = vrot.slane %v973_v54, %v977_v45  ;;  %v3868_v43 = vrot.slane %v973_v54, %v981_v24 }
 0x220   : > { %1074 = vmatpush1.bf16.msra.mxu0 %v2692_v3 }
 0x221   : > { %1075 = vmatprep.subr.bf16.mxu0 %v2693_v53  ;;  %2388 = vmatpush3.bf16.msra.mxu1 %v2709_v41 }
 0x222   : > { %2389 = vmatprep.subr.bf16.mxu1 %v2710_v21 }
 0x224   : > { %1076 = vmatpush1.bf16.msra.mxu0 %v2695_v1 }
 0x225   : > { %1077 = vmatprep.subr.bf16.mxu0 %v2696_v2  ;;  %2390 = vmatpush3.bf16.msra.mxu1 %v2711_v46 }
 0x226   : > { %2391 = vmatprep.subr.bf16.mxu1 %v2712_v52 }
 0x228   : > { %1078 = vmatpush1.bf16.msra.mxu0 %v2698_v27 }
 0x229   : > { %1079 = vmatprep.subr.bf16.mxu0 %v2699_v6  ;;  %2392 = vmatpush3.bf16.msra.mxu1 %v2713_v48 }
 0x22a   : > { %2393 = vmatprep.subr.bf16.mxu1 %v2714_v14 }
 0x22c   : > { %1080 = vmatpush1.bf16.msra.mxu0 %v2701_v44 }
 0x22d   : > { %2394 = vmatpush3.bf16.msra.mxu1 %v2715_v22 }
 0x22e   : > { %2395 = vmatprep.subr.bf16.mxu1 %v2716_v49 }
 0x22f   : > { %1098 = vmatmul.mubr.bf16.vlgmr.msra.gmra.mrb[0].mxu0 %v941_v34 }
 0x230   : > { %1107 = vmatprep.mubr.bf16.mxu0 %v3073_v32 }
 0x231   : > { %2396 = vmatpush3.bf16.msra.mxu1 %v2717_v59 }
 0x237   : > { %1108 = vmatmul.mubr.bf16.gmra.mrb[4].mxu0 %v942_v51 }
 0x238   : > { %1117 = vmatprep.mubr.bf16.mxu0 %v3073_v32 }
 0x23f   : > { %1118 = vmatmul.mubr.bf16.gmra.mrb[8].mxu0 %v943_v29 }
 0x240   : > { %1127 = vmatprep.mubr.bf16.mxu0 %v3073_v32 }
 0x247   : > { %1128 = vmatmul.mubr.bf16.gmra.mrb[12].mxu0 %v944_v38 }
 0x248   : > { %1137 = vmatprep.mubr.bf16.mxu0 %v3073_v32 }
 0x24f   : > { %1138 = vmatmul.mubr.bf16.gmra.mrb[16].mxu0 %v945_v12 }
 0x250   : > { %1147 = vmatprep.mubr.bf16.mxu0 %v3073_v32 }
 0x257   : > { %1148 = vmatmul.mubr.bf16.gmra.mrb[20].mxu0 %v946_v4 }
 0x258   : > { %1157 = vmatprep.mubr.bf16.mxu0 %v3073_v32 }
 0x25f   : > { %1158 = vmatmul.mubr.bf16.gmra.mrb[24].mxu0 %v947_v39 }
 0x260   : > { %1167 = vmatprep.mubr.bf16.mxu0 %v3073_v32 }
 0x267   : > { %1168 = vmatmul.mubr.bf16.gmra.mrb[28].mxu0 %v948_v61 }
 0x268   : > { %1177 = vmatprep.mubr.bf16.mxu0 %v3073_v32 }
 0x26f   : > { %1178 = vmatmul.mubr.bf16.gmra.mrb[32].mxu0 %v949_v40 }
 0x270   : > { %1187 = vmatprep.mubr.bf16.mxu0 %v3073_v32 }
 0x277   : > { %1188 = vmatmul.mubr.bf16.gmra.mrb[36].mxu0 %v950_v35 }
 0x278   : > { %1197 = vmatprep.mubr.bf16.mxu0 %v3073_v32 }
 0x27f   : > { %1198 = vmatmul.mubr.bf16.gmra.mrb[40].mxu0 %v951_v20 }
 0x280   : > { %1207 = vmatprep.mubr.bf16.mxu0 %v3073_v32 }
 0x287   : > { %1208 = vmatmul.mubr.bf16.gmra.mrb[44].mxu0 %v952_v31 }
 0x288   : > { %1217 = vmatprep.mubr.bf16.mxu0 %v3073_v32 }
 0x28f   : > { %1218 = vmatmul.mubr.bf16.gmra.mrb[48].mxu0 %v953_v47 }
 0x290   : > { %1227 = vmatprep.mubr.bf16.mxu0 %v3073_v32 }
 0x297   : > { %1228 = vmatmul.mubr.bf16.gmra.mrb[52].mxu0 %v954_v15 }
 0x298   : > { %1237 = vmatprep.mubr.bf16.mxu0 %v3073_v32 }
 0x29f   : > { %1238 = vmatmul.mubr.bf16.gmra.mrb[56].mxu0 %v955_v5 }
 0x2a0   : > { %1247 = vmatprep.mubr.bf16.mxu0 %v3073_v32 }
 0x2a7   : > { %1248 = vmatmul.mubr.bf16.gmra.mrb[60].mxu0 %v956_v8 }
 0x302   : > { %v1099_v55 = vpop.f32.mrb[0].mxu0 }
 0x303   : > { %v1100_v56 = vadd.f32 %v1099_v55, %v3866_v17  ;;  %v1101_v57 = vpop.f32.mrb[1].mxu0 }
 0x304   : > { %v1102_v58 = vadd.f32 %v1101_v57, %v3868_v43  ;;  %v1103_v37 = vpop.f32.mrb[2].mxu0 }
 0x305   : > { %v1322_v26 = vmul.f32 0.70710677, %v1100_v56  ;;  %v1104_v19 = vadd.f32 %v1103_v37, %v3866_v17  ;;  %v1105_v16 = vpop.f32.mrb[3].mxu0  ;;  %v1258_v11 = vmul.f32 0.5, %v1100_v56 }
 0x306   : > { %v1323_v28 = vmul.f32 0.70710677, %v1102_v58  ;;  %v1106_v25 = vadd.f32 %v1105_v16, %v3868_v43  ;;  %v1259_v35 = vmul.f32 0.5, %v1102_v58 }
 0x307   : > { %2718 = verf.f32 %v1322_v26  ;;  %v1324_v32 = vmul.f32 0.70710677, %v1104_v19  ;;  %v1260_v12 = vmul.f32 0.5, %v1104_v19 }
 0x308   : > { %2720 = verf.f32 %v1323_v28  ;;  %v1325_v42 = vmul.f32 0.70710677, %v1106_v25  ;;  %v1261_v41 = vmul.f32 0.5, %v1106_v25 }
 0x309   : > { %2722 = verf.f32 %v1324_v32 }
 0x30a   : > { %2724 = verf.f32 %v1325_v42  ;;  %v1109_v62 = vpop.f32.mrb[4].mxu0 }
 0x30b   : > { %v1110_v9 = vadd.f32 %v1109_v62, %v3866_v17  ;;  %v1111_v60 = vpop.f32.mrb[5].mxu0 }
 0x30c   : > { %v1112_v63 = vadd.f32 %v1111_v60, %v3868_v43  ;;  %v1113_v10 = vpop.f32.mrb[6].mxu0 }
 0x30d   : > { %v1326_v0 = vmul.f32 0.70710677, %v1110_v9  ;;  %v1114_v3 = vadd.f32 %v1113_v10, %v3866_v17  ;;  %v1115_v53 = vpop.f32.mrb[7].mxu0  ;;  %v1262_v56 = vmul.f32 0.5, %v1110_v9 }
 0x30e   : > { %v1327_v1 = vmul.f32 0.70710677, %v1112_v63  ;;  %v1116_v2 = vadd.f32 %v1115_v53, %v3868_v43  ;;  %v1263_v19 = vmul.f32 0.5, %v1112_v63 }
 0x30f   : > { %2726 = verf.f32 %v1326_v0  ;;  %v1328_v27 = vmul.f32 0.70710677, %v1114_v3  ;;  %v1264_v57 = vmul.f32 0.5, %v1114_v3 }
 0x310   : > { %2728 = verf.f32 %v1327_v1  ;;  %v1329_v6 = vmul.f32 0.70710677, %v1116_v2  ;;  %v1265_v16 = vmul.f32 0.5, %v1116_v2 }
 0x311   : > { %v2719_v7 = vpop.eup %2718  ;;  %2730 = verf.f32 %v1328_v27 }
 0x312   : > { %v2721_v18 = vpop.eup %2720  ;;  %2732 = verf.f32 %v1329_v6  ;;  %v1119_v33 = vpop.f32.mrb[8].mxu0  ;;  %v1450_v34 = vadd.f32 1.0, %v2719_v7 }
 0x313   : > { %v2723_v44 = vpop.eup %2722  ;;  %v3879_v51 = vadd.f32 %v1119_v33, %v3866_v17  ;;  %v1121_v29 = vpop.f32.mrb[9].mxu0  ;;  %v1451_v40 = vadd.f32 1.0, %v2721_v18 }
 0x314   : > { %v2725_v38 = vpop.eup %2724  ;;  %v1452_v4 = vadd.f32 1.0, %v2723_v44  ;;  %v3882_v39 = vadd.f32 %v1121_v29, %v3868_v43  ;;  %v1123_v61 = vpop.f32.mrb[10].mxu0  ;;  %v1514_v47 = vmul.f32 %v1450_v34, %v1258_v11 }
 0x315   : > { %v1330_v20 = vmul.f32 0.70710677, %v3879_v51  ;;  %v3886_v30 = vadd.f32 %v1123_v61, %v3866_v17  ;;  %v1125_v13 = vpop.f32.mrb[11].mxu0  ;;  %v1453_v31 = vadd.f32 1.0, %v2725_v38  ;;  %v1515_v14 = vmul.f32 %v1451_v40, %v1259_v35 }
 0x316   : > { %v1516_v36 = vmul.f32 %v1452_v4, %v1260_v12  ;;  %v1331_v21 = vmul.f32 0.70710677, %v3882_v39  ;;  %v3890_v46 = vadd.f32 %v1125_v13, %v3868_v43  ;;  %v1266_v38 = vmul.f32 0.5, %v3879_v51 }
 0x317   : > { %2734 = verf.f32 %v1330_v20  ;;  %v1332_v52 = vmul.f32 0.70710677, %v3886_v30  ;;  %v1517_v22 = vmul.f32 %v1453_v31, %v1261_v41  ;;  %v1268_v12 = vmul.f32 0.5, %v3886_v30 }
 0x318   : > { %2736 = verf.f32 %v1331_v21  ;;  %v1333_v48 = vmul.f32 0.70710677, %v3890_v46  ;;  %v1610_v49 = vpack.c.bf16 %v1516_v36, %v1514_v47  ;;  %v1267_v35 = vmul.f32 0.5, %v3882_v39 }
 0x319   : > { %v2727_v15 = vpop.eup %2726  ;;  %2738 = verf.f32 %v1332_v52  ;;  %v1611_v50 = vpack.c.bf16 %v1517_v22, %v1515_v14  ;;  %v1269_v20 = vmul.f32 0.5, %v3890_v46 }
 0x31a   : > { %v2729_v59 = vpop.eup %2728  ;;  %v1454_v5 = vadd.f32 1.0, %v2727_v15  ;;  %2740 = verf.f32 %v1333_v48  ;;  %v1129_v8 = vpop.f32.mrb[12].mxu0 }
 0x31b   : > { %v2731_v23 = vpop.eup %2730  ;;  %v1455_v45 = vadd.f32 1.0, %v2729_v59  ;;  %v3895_v54 = vadd.f32 %v1129_v8, %v3866_v17  ;;  %v1131_v24 = vpop.f32.mrb[13].mxu0  ;;  %1802 = vmatprep.mubr.bf16.mxu1 %v1611_v50 }
 0x31c   : > { %v2733_v55 = vpop.eup %2732  ;;  %v1456_v58 = vadd.f32 1.0, %v2731_v23  ;;  %v3898_v37 = vadd.f32 %v1131_v24, %v3868_v43  ;;  %v1133_v26 = vpop.f32.mrb[14].mxu0  ;;  %1803 = vmatmul.mubr.bf16.vlgmr.msra.gmra.mrb[0].mxu1 %v1610_v49  ;;  %v1518_v42 = vmul.f32 %v1454_v5, %v1262_v56 }
 0x31d   : > { %v1457_v28 = vadd.f32 1.0, %v2733_v55  ;;  %v1334_v25 = vmul.f32 0.70710677, %v3895_v54  ;;  %v1135_v32 = vpop.f32.mrb[15].mxu0  ;;  %v1134_v9 = vadd.f32 %v1133_v26, %v3866_v17  ;;  %v1519_v10 = vmul.f32 %v1455_v45, %v1263_v19 }
 0x31e   : > { %v1520_v62 = vmul.f32 %v1456_v58, %v1264_v57  ;;  %v1335_v60 = vmul.f32 0.70710677, %v3898_v37  ;;  %v1136_v3 = vadd.f32 %v1135_v32, %v3868_v43  ;;  %v1270_v45 = vmul.f32 0.5, %v3895_v54 }
 0x31f   : > { %v1521_v0 = vmul.f32 %v1457_v28, %v1265_v16  ;;  %2742 = verf.f32 %v1334_v25  ;;  %v1336_v53 = vmul.f32 0.70710677, %v1134_v9  ;;  %v1271_v58 = vmul.f32 0.5, %v3898_v37 }
 0x320   : > { %2744 = verf.f32 %v1335_v60  ;;  %v1612_v63 = vpack.c.bf16 %v1520_v62, %v1518_v42  ;;  %v1337_v2 = vmul.f32 0.70710677, %v1136_v3  ;;  %v1272_v26 = vmul.f32 0.5, %v1134_v9 }
 0x321   : > { %v2735_v1 = vpop.eup %2734  ;;  %v1613_v27 = vpack.c.bf16 %v1521_v0, %v1519_v10  ;;  %2746 = verf.f32 %v1336_v53  ;;  %v1273_v25 = vmul.f32 0.5, %v1136_v3 }
 0x322   : > { %v2737_v6 = vpop.eup %2736  ;;  %v1458_v7 = vadd.f32 1.0, %v2735_v1  ;;  %v1139_v18 = vpop.f32.mrb[16].mxu0  ;;  %2748 = verf.f32 %v1337_v2 }
 0x323   : > { %v2739_v33 = vpop.eup %2738  ;;  %v1459_v44 = vadd.f32 1.0, %v2737_v6  ;;  %v3905_v11 = vadd.f32 %v1139_v18, %v3866_v17  ;;  %v1141_v34 = vpop.f32.mrb[17].mxu0  ;;  %1810 = vmatprep.mubr.bf16.mxu1 %v1613_v27 }
 0x324   : > { %v2741_v29 = vpop.eup %2740  ;;  %v1460_v4 = vadd.f32 1.0, %v2739_v33  ;;  %v3910_v61 = vadd.f32 %v1141_v34, %v3868_v43  ;;  %v1143_v40 = vpop.f32.mrb[18].mxu0  ;;  %1811 = vmatmul.mubr.bf16.gmra.mrb[4].mxu1 %v1612_v63  ;;  %v1522_v41 = vmul.f32 %v1458_v7, %v1266_v38 }
 0x325   : > { %v1461_v13 = vadd.f32 1.0, %v2741_v29  ;;  %v1338_v31 = vmul.f32 0.70710677, %v3905_v11  ;;  %v1145_v36 = vpop.f32.mrb[19].mxu0  ;;  %v1144_v30 = vadd.f32 %v1143_v40, %v3866_v17  ;;  %v1523_v47 = vmul.f32 %v1459_v44, %v1267_v35 }
 0x326   : > { %v1524_v21 = vmul.f32 %v1460_v4, %v1268_v12  ;;  %v1339_v51 = vmul.f32 0.70710677, %v3910_v61  ;;  %v1146_v48 = vadd.f32 %v1145_v36, %v3868_v43  ;;  %v1274_v44 = vmul.f32 0.5, %v3905_v11 }
 0x327   : > { %v1525_v52 = vmul.f32 %v1461_v13, %v1269_v20  ;;  %2750 = verf.f32 %v1338_v31  ;;  %v1340_v39 = vmul.f32 0.70710677, %v1144_v30  ;;  %v1275_v4 = vmul.f32 0.5, %v3910_v61 }
 0x328   : > { %2752 = verf.f32 %v1339_v51  ;;  %v1614_v14 = vpack.c.bf16 %v1524_v21, %v1522_v41  ;;  %v1341_v22 = vmul.f32 0.70710677, %v1146_v48  ;;  %v1276_v40 = vmul.f32 0.5, %v1144_v30 }
 0x329   : > { %v2743_v46 = vpop.eup %2742  ;;  %v1615_v15 = vpack.c.bf16 %v1525_v52, %v1523_v47  ;;  %2754 = verf.f32 %v1340_v39  ;;  %v1277_v31 = vmul.f32 0.5, %v1146_v48 }
 0x32a   : > { %v2745_v49 = vpop.eup %2744  ;;  %v1149_v59 = vpop.f32.mrb[20].mxu0  ;;  %v1462_v5 = vadd.f32 1.0, %v2743_v46  ;;  %2756 = verf.f32 %v1341_v22 }
 0x32b   : > { %v3919_v8 = vadd.f32 %v1149_v59, %v3866_v17  ;;  %v1151_v50 = vpop.f32.mrb[21].mxu0  ;;  %1818 = vmatprep.mubr.bf16.mxu1 %v1615_v15  ;;  %v2747_v23 = vpop.eup %2746  ;;  %v1463_v24 = vadd.f32 1.0, %v2745_v49 }
 0x32c   : > { %v3923_v55 = vadd.f32 %v1151_v50, %v3868_v43  ;;  %v1153_v56 = vpop.f32.mrb[22].mxu0  ;;  %v2749_v57 = vpop.eup %2748  ;;  %v1464_v19 = vadd.f32 1.0, %v2747_v23  ;;  %1819 = vmatmul.mubr.bf16.gmra.mrb[8].mxu1 %v1614_v14  ;;  %v1526_v62 = vmul.f32 %v1462_v5, %v1270_v45 }
 0x32d   : > { %v1342_v16 = vmul.f32 0.70710677, %v3919_v8  ;;  %v1155_v28 = vpop.f32.mrb[23].mxu0  ;;  %v1465_v32 = vadd.f32 1.0, %v2749_v57  ;;  %v3929_v54 = vadd.f32 %v1153_v56, %v3866_v17  ;;  %v1527_v37 = vmul.f32 %v1463_v24, %v1271_v58 }
 0x32e   : > { %v1343_v42 = vmul.f32 0.70710677, %v3923_v55  ;;  %v1528_v60 = vmul.f32 %v1464_v19, %v1272_v26  ;;  %v3932_v10 = vadd.f32 %v1155_v28, %v3868_v43  ;;  %v1278_v23 = vmul.f32 0.5, %v3919_v8 }
 0x32f   : > { %2758 = verf.f32 %v1342_v16  ;;  %v1529_v9 = vmul.f32 %v1465_v32, %v1273_v25  ;;  %v1344_v0 = vmul.f32 0.70710677, %v3929_v54  ;;  %v1279_v58 = vmul.f32 0.5, %v3923_v55 }
 0x330   : > { %2760 = verf.f32 %v1343_v42  ;;  %v1345_v3 = vmul.f32 0.70710677, %v3932_v10  ;;  %v1616_v63 = vpack.c.bf16 %v1528_v60, %v1526_v62  ;;  %v1280_v26 = vmul.f32 0.5, %v3929_v54 }
 0x331   : > { %v2751_v53 = vpop.eup %2750  ;;  %2762 = verf.f32 %v1344_v0  ;;  %v1617_v27 = vpack.c.bf16 %v1529_v9, %v1527_v37  ;;  %v1281_v25 = vmul.f32 0.5, %v3932_v10 }
 0x332   : > { %v2753_v1 = vpop.eup %2752  ;;  %v1159_v2 = vpop.f32.mrb[24].mxu0  ;;  %v1466_v6 = vadd.f32 1.0, %v2751_v53  ;;  %2764 = verf.f32 %v1345_v3 }
 0x333   : > { %v3937_v7 = vadd.f32 %v1159_v2, %v3866_v17  ;;  %v1161_v18 = vpop.f32.mrb[25].mxu0  ;;  %v2755_v33 = vpop.eup %2754  ;;  %v1467_v34 = vadd.f32 1.0, %v2753_v1  ;;  %1826 = vmatprep.mubr.bf16.mxu1 %v1617_v27 }
 0x334   : > { %v3941_v29 = vadd.f32 %v1161_v18, %v3868_v43  ;;  %v1163_v38 = vpop.f32.mrb[26].mxu0  ;;  %v2757_v12 = vpop.eup %2756  ;;  %v1468_v35 = vadd.f32 1.0, %v2755_v33  ;;  %1827 = vmatmul.mubr.bf16.gmra.mrb[12].mxu1 %v1616_v63  ;;  %v1530_v21 = vmul.f32 %v1466_v6, %v1274_v44 }
 0x335   : > { %v1346_v20 = vmul.f32 0.70710677, %v3937_v7  ;;  %v1165_v13 = vpop.f32.mrb[27].mxu0  ;;  %v1469_v36 = vadd.f32 1.0, %v2757_v12  ;;  %v3947_v11 = vadd.f32 %v1163_v38, %v3866_v17  ;;  %v1531_v61 = vmul.f32 %v1467_v34, %v1275_v4 }
 0x336   : > { %v1347_v41 = vmul.f32 0.70710677, %v3941_v29  ;;  %v1532_v51 = vmul.f32 %v1468_v35, %v1276_v40  ;;  %v3950_v47 = vadd.f32 %v1165_v13, %v3868_v43  ;;  %v1282_v33 = vmul.f32 0.5, %v3937_v7 }
 0x337   : > { %2766 = verf.f32 %v1346_v20  ;;  %v1533_v30 = vmul.f32 %v1469_v36, %v1277_v31  ;;  %v1348_v52 = vmul.f32 0.70710677, %v3947_v11  ;;  %v1283_v4 = vmul.f32 0.5, %v3941_v29 }
 0x338   : > { %2768 = verf.f32 %v1347_v41  ;;  %v1349_v48 = vmul.f32 0.70710677, %v3950_v47  ;;  %v1618_v14 = vpack.c.bf16 %v1532_v51, %v1530_v21  ;;  %v1284_v40 = vmul.f32 0.5, %v3947_v11 }
 0x339   : > { %v2759_v39 = vpop.eup %2758  ;;  %2770 = verf.f32 %v1348_v52  ;;  %v1619_v15 = vpack.c.bf16 %v1533_v30, %v1531_v61  ;;  %v1285_v31 = vmul.f32 0.5, %v3950_v47 }
 0x33a   : > { %v2761_v46 = vpop.eup %2760  ;;  %v1169_v22 = vpop.f32.mrb[28].mxu0  ;;  %v1470_v49 = vadd.f32 1.0, %v2759_v39  ;;  %2772 = verf.f32 %v1349_v48 }
 0x33b   : > { %v3955_v59 = vadd.f32 %v1169_v22, %v3866_v17  ;;  %v1171_v5 = vpop.f32.mrb[29].mxu0  ;;  %v2763_v50 = vpop.eup %2762  ;;  %v1471_v45 = vadd.f32 1.0, %v2761_v46  ;;  %1834 = vmatprep.mubr.bf16.mxu1 %v1619_v15 }
 0x33c   : > { %v3959_v24 = vadd.f32 %v1171_v5, %v3868_v43  ;;  %v1173_v56 = vpop.f32.mrb[30].mxu0  ;;  %v2765_v57 = vpop.eup %2764  ;;  %v1472_v19 = vadd.f32 1.0, %v2763_v50  ;;  %1835 = vmatmul.mubr.bf16.gmra.mrb[16].mxu1 %v1618_v14  ;;  %v1534_v62 = vmul.f32 %v1470_v49, %v1278_v23 }
 0x33d   : > { %v1350_v16 = vmul.f32 0.70710677, %v3955_v59  ;;  %v1175_v28 = vpop.f32.mrb[31].mxu0  ;;  %v1473_v32 = vadd.f32 1.0, %v2765_v57  ;;  %v3967_v42 = vadd.f32 %v1173_v56, %v3866_v17  ;;  %v1535_v54 = vmul.f32 %v1471_v45, %v1279_v58 }
 0x33e   : > { %v1351_v8 = vmul.f32 0.70710677, %v3959_v24  ;;  %v1536_v60 = vmul.f32 %v1472_v19, %v1280_v26  ;;  %v3970_v55 = vadd.f32 %v1175_v28, %v3868_v43  ;;  %v1286_v50 = vmul.f32 0.5, %v3955_v59 }
 0x33f   : > { %2774 = verf.f32 %v1350_v16  ;;  %v1537_v37 = vmul.f32 %v1473_v32, %v1281_v25  ;;  %v1352_v9 = vmul.f32 0.70710677, %v3967_v42  ;;  %v1287_v58 = vmul.f32 0.5, %v3959_v24 }
 0x340   : > { %2776 = verf.f32 %v1351_v8  ;;  %v1353_v10 = vmul.f32 0.70710677, %v3970_v55  ;;  %v1620_v53 = vpack.c.bf16 %v1536_v60, %v1534_v62  ;;  %v1288_v26 = vmul.f32 0.5, %v3967_v42 }
 0x341   : > { %v2767_v0 = vpop.eup %2766  ;;  %2778 = verf.f32 %v1352_v9  ;;  %v1621_v1 = vpack.c.bf16 %v1537_v37, %v1535_v54  ;;  %v1289_v25 = vmul.f32 0.5, %v3970_v55 }
 0x342   : > { %v2769_v3 = vpop.eup %2768  ;;  %v1179_v63 = vpop.f32.mrb[32].mxu0  ;;  %v1474_v2 = vadd.f32 1.0, %v2767_v0  ;;  %2780 = verf.f32 %v1353_v10 }
 0x343   : > { %v3975_v27 = vadd.f32 %v1179_v63, %v3866_v17  ;;  %v1181_v6 = vpop.f32.mrb[33].mxu0  ;;  %v2771_v18 = vpop.eup %2770  ;;  %v1475_v44 = vadd.f32 1.0, %v2769_v3  ;;  %1842 = vmatprep.mubr.bf16.mxu1 %v1621_v1 }
 0x344   : > { %v3979_v34 = vadd.f32 %v1181_v6, %v3868_v43  ;;  %v1183_v38 = vpop.f32.mrb[34].mxu0  ;;  %v2773_v12 = vpop.eup %2772  ;;  %v1476_v35 = vadd.f32 1.0, %v2771_v18  ;;  %1843 = vmatmul.mubr.bf16.gmra.mrb[20].mxu1 %v1620_v53  ;;  %v1538_v21 = vmul.f32 %v1474_v2, %v1282_v33 }
 0x345   : > { %v1354_v20 = vmul.f32 0.70710677, %v3975_v27  ;;  %v1185_v13 = vpop.f32.mrb[35].mxu0  ;;  %v1477_v36 = vadd.f32 1.0, %v2773_v12  ;;  %v3987_v41 = vadd.f32 %v1183_v38, %v3866_v17  ;;  %v1539_v11 = vmul.f32 %v1475_v44, %v1283_v4 }
 0x346   : > { %v1355_v7 = vmul.f32 0.70710677, %v3979_v34  ;;  %v1540_v51 = vmul.f32 %v1476_v35, %v1284_v40  ;;  %v3990_v29 = vadd.f32 %v1185_v13, %v3868_v43  ;;  %v1290_v18 = vmul.f32 0.5, %v3975_v27 }
 0x347   : > { %2782 = verf.f32 %v1354_v20  ;;  %v1541_v61 = vmul.f32 %v1477_v36, %v1285_v31  ;;  %v1356_v30 = vmul.f32 0.70710677, %v3987_v41  ;;  %v1291_v4 = vmul.f32 0.5, %v3979_v34 }
 0x348   : > { %2784 = verf.f32 %v1355_v7  ;;  %v1357_v47 = vmul.f32 0.70710677, %v3990_v29  ;;  %v1622_v39 = vpack.c.bf16 %v1540_v51, %v1538_v21  ;;  %v1292_v40 = vmul.f32 0.5, %v3987_v41 }
 0x349   : > { %v2775_v52 = vpop.eup %2774  ;;  %2786 = verf.f32 %v1356_v30  ;;  %v1623_v46 = vpack.c.bf16 %v1541_v61, %v1539_v11  ;;  %v1293_v31 = vmul.f32 0.5, %v3990_v29 }
 0x34a   : > { %v2777_v48 = vpop.eup %2776  ;;  %v1189_v14 = vpop.f32.mrb[36].mxu0  ;;  %v1478_v22 = vadd.f32 1.0, %v2775_v52  ;;  %2788 = verf.f32 %v1357_v47 }
 0x34b   : > { %v3995_v15 = vadd.f32 %v1189_v14, %v3866_v17  ;;  %v1191_v49 = vpop.f32.mrb[37].mxu0  ;;  %v2779_v5 = vpop.eup %2778  ;;  %v1479_v23 = vadd.f32 1.0, %v2777_v48  ;;  %1850 = vmatprep.mubr.bf16.mxu1 %v1623_v46 }
 0x34c   : > { %v3999_v45 = vadd.f32 %v1191_v49, %v3868_v43  ;;  %v1193_v56 = vpop.f32.mrb[38].mxu0  ;;  %v2781_v57 = vpop.eup %2780  ;;  %v1480_v19 = vadd.f32 1.0, %v2779_v5  ;;  %1851 = vmatmul.mubr.bf16.gmra.mrb[24].mxu1 %v1622_v39  ;;  %v1542_v62 = vmul.f32 %v1478_v22, %v1286_v50 }
 0x34d   : > { %v1358_v16 = vmul.f32 0.70710677, %v3995_v15  ;;  %v1195_v28 = vpop.f32.mrb[39].mxu0  ;;  %v1481_v32 = vadd.f32 1.0, %v2781_v57  ;;  %v4007_v8 = vadd.f32 %v1193_v56, %v3866_v17  ;;  %v1543_v42 = vmul.f32 %v1479_v23, %v1287_v58 }
 0x34e   : > { %v1359_v59 = vmul.f32 0.70710677, %v3999_v45  ;;  %v1544_v60 = vmul.f32 %v1480_v19, %v1288_v26  ;;  %v4010_v24 = vadd.f32 %v1195_v28, %v3868_v43  ;;  %v1294_v5 = vmul.f32 0.5, %v3995_v15 }
 0x34f   : > { %2790 = verf.f32 %v1358_v16  ;;  %v1545_v54 = vmul.f32 %v1481_v32, %v1289_v25  ;;  %v1360_v37 = vmul.f32 0.70710677, %v4007_v8  ;;  %v1295_v58 = vmul.f32 0.5, %v3999_v45 }
 0x350   : > { %2792 = verf.f32 %v1359_v59  ;;  %v1361_v55 = vmul.f32 0.70710677, %v4010_v24  ;;  %v1624_v0 = vpack.c.bf16 %v1544_v60, %v1542_v62  ;;  %v1296_v26 = vmul.f32 0.5, %v4007_v8 }
 0x351   : > { %v2783_v9 = vpop.eup %2782  ;;  %2794 = verf.f32 %v1360_v37  ;;  %v1625_v3 = vpack.c.bf16 %v1545_v54, %v1543_v42  ;;  %v1297_v25 = vmul.f32 0.5, %v4010_v24 }
 0x352   : > { %v2785_v10 = vpop.eup %2784  ;;  %v1199_v53 = vpop.f32.mrb[40].mxu0  ;;  %v1482_v63 = vadd.f32 1.0, %v2783_v9  ;;  %2796 = verf.f32 %v1361_v55 }
 0x353   : > { %v4015_v1 = vadd.f32 %v1199_v53, %v3866_v17  ;;  %v1201_v2 = vpop.f32.mrb[41].mxu0  ;;  %v2787_v6 = vpop.eup %2786  ;;  %v1483_v33 = vadd.f32 1.0, %v2785_v10  ;;  %1858 = vmatprep.mubr.bf16.mxu1 %v1625_v3 }
 0x354   : > { %v4019_v44 = vadd.f32 %v1201_v2, %v3868_v43  ;;  %v1203_v38 = vpop.f32.mrb[42].mxu0  ;;  %v2789_v12 = vpop.eup %2788  ;;  %v1484_v35 = vadd.f32 1.0, %v2787_v6  ;;  %1859 = vmatmul.mubr.bf16.gmra.mrb[28].mxu1 %v1624_v0  ;;  %v1546_v21 = vmul.f32 %v1482_v63, %v1290_v18 }
 0x355   : > { %v1362_v20 = vmul.f32 0.70710677, %v4015_v1  ;;  %v1205_v13 = vpop.f32.mrb[43].mxu0  ;;  %v1485_v36 = vadd.f32 1.0, %v2789_v12  ;;  %v4027_v7 = vadd.f32 %v1203_v38, %v3866_v17  ;;  %v1547_v41 = vmul.f32 %v1483_v33, %v1291_v4 }
 0x356   : > { %v1363_v27 = vmul.f32 0.70710677, %v4019_v44  ;;  %v1548_v51 = vmul.f32 %v1484_v35, %v1292_v40  ;;  %v4030_v34 = vadd.f32 %v1205_v13, %v3868_v43  ;;  %v1298_v6 = vmul.f32 0.5, %v4015_v1 }
 0x357   : > { %2798 = verf.f32 %v1362_v20  ;;  %v1549_v11 = vmul.f32 %v1485_v36, %v1293_v31  ;;  %v1364_v61 = vmul.f32 0.70710677, %v4027_v7  ;;  %v1299_v4 = vmul.f32 0.5, %v4019_v44 }
 0x358   : > { %2800 = verf.f32 %v1363_v27  ;;  %v1365_v29 = vmul.f32 0.70710677, %v4030_v34  ;;  %v1626_v52 = vpack.c.bf16 %v1548_v51, %v1546_v21  ;;  %v1300_v40 = vmul.f32 0.5, %v4027_v7 }
 0x359   : > { %v2791_v30 = vpop.eup %2790  ;;  %2802 = verf.f32 %v1364_v61  ;;  %v1627_v48 = vpack.c.bf16 %v1549_v11, %v1547_v41  ;;  %v1301_v31 = vmul.f32 0.5, %v4030_v34 }
 0x35a   : > { %v2793_v47 = vpop.eup %2792  ;;  %v1209_v39 = vpop.f32.mrb[44].mxu0  ;;  %v1486_v14 = vadd.f32 1.0, %v2791_v30  ;;  %2804 = verf.f32 %v1365_v29 }
 0x35b   : > { %v4035_v46 = vadd.f32 %v1209_v39, %v3866_v17  ;;  %v1211_v22 = vpop.f32.mrb[45].mxu0  ;;  %v2795_v49 = vpop.eup %2794  ;;  %v1487_v50 = vadd.f32 1.0, %v2793_v47  ;;  %1866 = vmatprep.mubr.bf16.mxu1 %v1627_v48 }
 0x35c   : > { %v4039_v23 = vadd.f32 %v1211_v22, %v3868_v43  ;;  %v1213_v56 = vpop.f32.mrb[46].mxu0  ;;  %v2797_v57 = vpop.eup %2796  ;;  %v1488_v19 = vadd.f32 1.0, %v2795_v49  ;;  %1867 = vmatmul.mubr.bf16.gmra.mrb[32].mxu1 %v1626_v52  ;;  %v1550_v62 = vmul.f32 %v1486_v14, %v1294_v5 }
 0x35d   : > { %v1366_v16 = vmul.f32 0.70710677, %v4035_v46  ;;  %v1215_v28 = vpop.f32.mrb[47].mxu0  ;;  %v1489_v32 = vadd.f32 1.0, %v2797_v57  ;;  %v4047_v59 = vadd.f32 %v1213_v56, %v3866_v17  ;;  %v1551_v8 = vmul.f32 %v1487_v50, %v1295_v58 }
 0x35e   : > { %v1367_v15 = vmul.f32 0.70710677, %v4039_v23  ;;  %v1552_v60 = vmul.f32 %v1488_v19, %v1296_v26  ;;  %v4050_v45 = vadd.f32 %v1215_v28, %v3868_v43  ;;  %v1302_v49 = vmul.f32 0.5, %v4035_v46 }
 0x35f   : > { %2806 = verf.f32 %v1366_v16  ;;  %v1553_v42 = vmul.f32 %v1489_v32, %v1297_v25  ;;  %v1368_v54 = vmul.f32 0.70710677, %v4047_v59  ;;  %v1303_v58 = vmul.f32 0.5, %v4039_v23 }
 0x360   : > { %2808 = verf.f32 %v1367_v15  ;;  %v1369_v24 = vmul.f32 0.70710677, %v4050_v45  ;;  %v1628_v9 = vpack.c.bf16 %v1552_v60, %v1550_v62  ;;  %v1304_v26 = vmul.f32 0.5, %v4047_v59 }
 0x361   : > { %v2799_v37 = vpop.eup %2798  ;;  %2810 = verf.f32 %v1368_v54  ;;  %v1629_v10 = vpack.c.bf16 %v1553_v42, %v1551_v8  ;;  %v1305_v25 = vmul.f32 0.5, %v4050_v45 }
 0x362   : > { %v2801_v55 = vpop.eup %2800  ;;  %v1219_v0 = vpop.f32.mrb[48].mxu0  ;;  %v1490_v53 = vadd.f32 1.0, %v2799_v37  ;;  %2812 = verf.f32 %v1369_v24 }
 0x363   : > { %v4055_v3 = vadd.f32 %v1219_v0, %v3866_v17  ;;  %v1221_v63 = vpop.f32.mrb[49].mxu0  ;;  %v2803_v2 = vpop.eup %2802  ;;  %v1491_v18 = vadd.f32 1.0, %v2801_v55  ;;  %1874 = vmatprep.mubr.bf16.mxu1 %v1629_v10 }
 0x364   : > { %v4059_v33 = vadd.f32 %v1221_v63, %v3868_v43  ;;  %v1223_v38 = vpop.f32.mrb[50].mxu0  ;;  %v2805_v12 = vpop.eup %2804  ;;  %v1492_v35 = vadd.f32 1.0, %v2803_v2  ;;  %1875 = vmatmul.mubr.bf16.gmra.mrb[36].mxu1 %v1628_v9  ;;  %v1554_v21 = vmul.f32 %v1490_v53, %v1298_v6 }
 0x365   : > { %v1370_v20 = vmul.f32 0.70710677, %v4055_v3  ;;  %v1225_v13 = vpop.f32.mrb[51].mxu0  ;;  %v1493_v36 = vadd.f32 1.0, %v2805_v12  ;;  %v4067_v27 = vadd.f32 %v1223_v38, %v3866_v17  ;;  %v1555_v7 = vmul.f32 %v1491_v18, %v1299_v4 }
 0x366   : > { %v1371_v1 = vmul.f32 0.70710677, %v4059_v33  ;;  %v1556_v51 = vmul.f32 %v1492_v35, %v1300_v40  ;;  %v4070_v44 = vadd.f32 %v1225_v13, %v3868_v43  ;;  %v1306_v2 = vmul.f32 0.5, %v4055_v3 }
 0x367   : > { %2814 = verf.f32 %v1370_v20  ;;  %v1557_v41 = vmul.f32 %v1493_v36, %v1301_v31  ;;  %v1372_v11 = vmul.f32 0.70710677, %v4067_v27  ;;  %v1307_v4 = vmul.f32 0.5, %v4059_v33 }
 0x368   : > { %2816 = verf.f32 %v1371_v1  ;;  %v1373_v34 = vmul.f32 0.70710677, %v4070_v44  ;;  %v1630_v30 = vpack.c.bf16 %v1556_v51, %v1554_v21  ;;  %v1308_v40 = vmul.f32 0.5, %v4067_v27 }
 0x369   : > { %v2807_v61 = vpop.eup %2806  ;;  %2818 = verf.f32 %v1372_v11  ;;  %v1631_v47 = vpack.c.bf16 %v1557_v41, %v1555_v7  ;;  %v1309_v31 = vmul.f32 0.5, %v4070_v44 }
 0x36a   : > { %v2809_v29 = vpop.eup %2808  ;;  %v1229_v52 = vpop.f32.mrb[52].mxu0  ;;  %v1494_v39 = vadd.f32 1.0, %v2807_v61  ;;  %2820 = verf.f32 %v1373_v34 }
 0x36b   : > { %v4075_v48 = vadd.f32 %v1229_v52, %v3866_v17  ;;  %v1231_v14 = vpop.f32.mrb[53].mxu0  ;;  %v2811_v22 = vpop.eup %2810  ;;  %v1495_v5 = vadd.f32 1.0, %v2809_v29  ;;  %1882 = vmatprep.mubr.bf16.mxu1 %v1631_v47 }
 0x36c   : > { %v4079_v50 = vadd.f32 %v1231_v14, %v3868_v43  ;;  %v1233_v56 = vpop.f32.mrb[54].mxu0  ;;  %v2813_v57 = vpop.eup %2812  ;;  %v1496_v19 = vadd.f32 1.0, %v2811_v22  ;;  %1883 = vmatmul.mubr.bf16.gmra.mrb[40].mxu1 %v1630_v30  ;;  %v1558_v62 = vmul.f32 %v1494_v39, %v1302_v49 }
 0x36d   : > { %v1374_v16 = vmul.f32 0.70710677, %v4075_v48  ;;  %v1235_v28 = vpop.f32.mrb[55].mxu0  ;;  %v1497_v32 = vadd.f32 1.0, %v2813_v57  ;;  %v4087_v15 = vadd.f32 %v1233_v56, %v3866_v17  ;;  %v1559_v59 = vmul.f32 %v1495_v5, %v1303_v58 }
 0x36e   : > { %v1375_v46 = vmul.f32 0.70710677, %v4079_v50  ;;  %v1560_v60 = vmul.f32 %v1496_v19, %v1304_v26  ;;  %v4090_v23 = vadd.f32 %v1235_v28, %v3868_v43  ;;  %v1310_v22 = vmul.f32 0.5, %v4075_v48 }
 0x36f   : > { %2822 = verf.f32 %v1374_v16  ;;  %v1561_v8 = vmul.f32 %v1497_v32, %v1305_v25  ;;  %v1376_v42 = vmul.f32 0.70710677, %v4087_v15  ;;  %v1311_v58 = vmul.f32 0.5, %v4079_v50 }
 0x370   : > { %2824 = verf.f32 %v1375_v46  ;;  %v1377_v45 = vmul.f32 0.70710677, %v4090_v23  ;;  %v1632_v37 = vpack.c.bf16 %v1560_v60, %v1558_v62  ;;  %v1312_v26 = vmul.f32 0.5, %v4087_v15 }
 0x371   : > { %v2815_v54 = vpop.eup %2814  ;;  %2826 = verf.f32 %v1376_v42  ;;  %v1633_v55 = vpack.c.bf16 %v1561_v8, %v1559_v59  ;;  %v1313_v25 = vmul.f32 0.5, %v4090_v23 }
 0x372   : > { %v2817_v24 = vpop.eup %2816  ;;  %v1239_v9 = vpop.f32.mrb[56].mxu0  ;;  %v1498_v0 = vadd.f32 1.0, %v2815_v54  ;;  %2828 = verf.f32 %v1377_v45 }
 0x373   : > { %v4095_v10 = vadd.f32 %v1239_v9, %v3866_v17  ;;  %v1241_v53 = vpop.f32.mrb[57].mxu0  ;;  %v2819_v63 = vpop.eup %2818  ;;  %v1499_v6 = vadd.f32 1.0, %v2817_v24  ;;  %1890 = vmatprep.mubr.bf16.mxu1 %v1633_v55 }
 0x374   : > { %v4099_v18 = vadd.f32 %v1241_v53, %v3868_v43  ;;  %v1243_v38 = vpop.f32.mrb[58].mxu0  ;;  %v2821_v12 = vpop.eup %2820  ;;  %v1500_v35 = vadd.f32 1.0, %v2819_v63  ;;  %1891 = vmatmul.mubr.bf16.gmra.mrb[44].mxu1 %v1632_v37  ;;  %v1562_v21 = vmul.f32 %v1498_v0, %v1306_v2 }
 0x375   : > { %v1378_v20 = vmul.f32 0.70710677, %v4095_v10  ;;  %v1245_v13 = vpop.f32.mrb[59].mxu0  ;;  %v1501_v36 = vadd.f32 1.0, %v2821_v12  ;;  %v1244_v1 = vadd.f32 %v1243_v38, %v3866_v17  ;;  %v1563_v33 = vmul.f32 %v1499_v6, %v1307_v4 }
 0x376   : > { %v1379_v3 = vmul.f32 0.70710677, %v4099_v18  ;;  %v1564_v51 = vmul.f32 %v1500_v35, %v1308_v40  ;;  %v1246_v7 = vadd.f32 %v1245_v13, %v3868_v43  ;;  %v1314_v0 = vmul.f32 0.5, %v4095_v10 }
 0x377   : > { %2830 = verf.f32 %v1378_v20  ;;  %v1565_v41 = vmul.f32 %v1501_v36, %v1309_v31  ;;  %v1380_v27 = vmul.f32 0.70710677, %v1244_v1  ;;  %v1316_v53 = vmul.f32 0.5, %v1244_v1 }
 0x378   : > { %2832 = verf.f32 %v1379_v3  ;;  %v1381_v61 = vmul.f32 0.70710677, %v1246_v7  ;;  %v1634_v34 = vpack.c.bf16 %v1564_v51, %v1562_v21  ;;  %v1315_v63 = vmul.f32 0.5, %v4099_v18 }
 0x379   : > { %v2823_v11 = vpop.eup %2822  ;;  %2834 = verf.f32 %v1380_v27  ;;  %v1635_v29 = vpack.c.bf16 %v1565_v41, %v1563_v33  ;;  %v1317_v2 = vmul.f32 0.5, %v1246_v7 }
 0x37a   : > { %v2825_v30 = vpop.eup %2824  ;;  %v1249_v44 = vpop.f32.mrb[60].mxu0  ;;  %v1502_v52 = vadd.f32 1.0, %v2823_v11  ;;  %2836 = verf.f32 %v1381_v61 }
 0x37b   : > { %v1250_v47 = vadd.f32 %v1249_v44, %v3866_v17  ;;  %v1251_v39 = vpop.f32.mrb[61].mxu0  ;;  %v2827_v14 = vpop.eup %2826  ;;  %v1503_v49 = vadd.f32 1.0, %v2825_v30  ;;  %1898 = vmatprep.mubr.bf16.mxu1 %v1635_v29 }
 0x37c   : > { %v1252_v5 = vadd.f32 %v1251_v39, %v3868_v43  ;;  %v1253_v56 = vpop.f32.mrb[62].mxu0  ;;  %v2829_v57 = vpop.eup %2828  ;;  %v1504_v19 = vadd.f32 1.0, %v2827_v14  ;;  %1899 = vmatmul.mubr.bf16.gmra.mrb[48].mxu1 %v1634_v34  ;;  %v1566_v62 = vmul.f32 %v1502_v52, %v1310_v22  ;;  %v1578_v52 = vld [vmem:[#allocation3] sm:$0xff] }
 0x37d   : > { %v1382_v16 = vmul.f32 0.70710677, %v1250_v47  ;;  %v1255_v28 = vpop.f32.mrb[63].mxu0  ;;  %v1505_v32 = vadd.f32 1.0, %v2829_v57  ;;  %v1254_v48 = vadd.f32 %v1253_v56, %v3866_v17  ;;  %v1567_v8 = vmul.f32 %v1503_v49, %v1311_v58 }
 0x37e   : > { %v1383_v46 = vmul.f32 0.70710677, %v1252_v5  ;;  %v1568_v60 = vmul.f32 %v1504_v19, %v1312_v26  ;;  %v1256_v59 = vadd.f32 %v1255_v28, %v3868_v43  ;;  %v1318_v1 = vmul.f32 0.5, %v1250_v47  ;;  %v1579_v47 = vld [vmem:[#allocation3 + $0x8] sm:$0xff]  ;;  %v1580_v26 = vld [vmem:[#allocation3 + $0x10] sm:$0xff] }
 0x37f   : > { %2838 = verf.f32 %v1382_v16  ;;  %v1569_v42 = vmul.f32 %v1505_v32, %v1313_v25  ;;  %v1384_v50 = vmul.f32 0.70710677, %v1254_v48  ;;  %v1320_v51 = vmul.f32 0.5, %v1254_v48  ;;  %v1581_v25 = vld [vmem:[#allocation3 + $0x18] sm:$0xff] }
 0x380   : > { %2840 = verf.f32 %v1383_v46  ;;  %v1385_v54 = vmul.f32 0.70710677, %v1256_v59  ;;  %v1636_v45 = vpack.c.bf16 %v1568_v60, %v1566_v62  ;;  %v1319_v18 = vmul.f32 0.5, %v1252_v5 }
 0x381   : > { %v2831_v15 = vpop.eup %2830  ;;  %2842 = verf.f32 %v1384_v50  ;;  %v1637_v24 = vpack.c.bf16 %v1569_v42, %v1567_v8  ;;  %v1321_v7 = vmul.f32 0.5, %v1256_v59  ;;  %v1582_v59 = vld [vmem:[#allocation3 + $0x20] sm:$0xff] }
 0x382   : > { %v2833_v37 = vpop.eup %2832  ;;  %v1506_v23 = vadd.f32 1.0, %v2831_v15  ;;  %2844 = verf.f32 %v1385_v54  ;;  %v1583_v15 = vld [vmem:[#allocation3 + $0x28] sm:$0xff] }
 0x383   : > { %v2835_v9 = vpop.eup %2834  ;;  %v1507_v55 = vadd.f32 1.0, %v2833_v37  ;;  %1906 = vmatprep.mubr.bf16.mxu1 %v1637_v24 }
 0x384   : > { %v2837_v17 = vpop.eup %2836  ;;  %v1508_v43 = vadd.f32 1.0, %v2835_v9  ;;  %1907 = vmatmul.mubr.bf16.gmra.mrb[52].mxu1 %v1636_v45  ;;  %v1570_v38 = vmul.f32 %v1506_v23, %v1314_v0  ;;  %v1584_v9 = vld [vmem:[#allocation3 + $0x30] sm:$0xff] }
 0x385   : > { %v1509_v6 = vadd.f32 1.0, %v2837_v17  ;;  %v1571_v4 = vmul.f32 %v1507_v55, %v1315_v63 }
 0x386   : > { %v1572_v12 = vmul.f32 %v1508_v43, %v1316_v53  ;;  %v1585_v53 = vld [vmem:[#allocation3 + $0x38] sm:$0xff] }
 0x387   : > { %v1573_v40 = vmul.f32 %v1509_v6, %v1317_v2 }
 0x388   : > { %v1638_v20 = vpack.c.bf16 %v1572_v12, %v1570_v38  ;;  %v1586_v12 = vld [vmem:[#allocation3 + $0x40] sm:$0xff] }
 0x389   : > { %v2839_v35 = vpop.eup %2838  ;;  %v1639_v31 = vpack.c.bf16 %v1573_v40, %v1571_v4 }
 0x38a   : > { %v2841_v13 = vpop.eup %2840  ;;  %v1510_v36 = vadd.f32 1.0, %v2839_v35 }
 0x38b   : > { %v2843_v3 = vpop.eup %2842  ;;  %v1511_v21 = vadd.f32 1.0, %v2841_v13  ;;  %1914 = vmatprep.mubr.bf16.mxu1 %v1639_v31 }
 0x38c   : > { %v2845_v10 = vpop.eup %2844  ;;  %v1512_v33 = vadd.f32 1.0, %v2843_v3  ;;  %1915 = vmatmul.mubr.bf16.gmra.mrb[56].mxu1 %v1638_v20  ;;  %v1574_v27 = vmul.f32 %v1510_v36, %v1318_v1  ;;  %v1587_v20 = vld [vmem:[#allocation3 + $0x48] sm:$0xff] }
 0x38d   : > { %v1513_v41 = vadd.f32 1.0, %v2845_v10  ;;  %v1575_v61 = vmul.f32 %v1511_v21, %v1319_v18  ;;  %v1588_v10 = vld [vmem:[#allocation3 + $0x50] sm:$0xff]  ;;  %v1589_v18 = vld [vmem:[#allocation3 + $0x58] sm:$0xff] }
 0x38e   : > { %v1576_v11 = vmul.f32 %v1512_v33, %v1320_v51 }
 0x38f   : > { %v1577_v34 = vmul.f32 %v1513_v41, %v1321_v7 }
 0x390   : > { %v1640_v30 = vpack.c.bf16 %v1576_v11, %v1574_v27 }
 0x391   : > { %v1641_v44 = vpack.c.bf16 %v1577_v34, %v1575_v61  ;;  %v1590_v34 = vld [vmem:[#allocation3 + $0x60] sm:$0xff] }
 0x393   : > { %1922 = vmatprep.mubr.bf16.mxu1 %v1641_v44 }
 0x394   : > { %1923 = vmatmul.mubr.bf16.gmra.mrb[60].mxu1 %v1640_v30 }
 0x3ef   : > { %v2397_v29 = vpop.f32.mrb[0].mxu1 }
 0x3f0   : > { %v2398_v39 = vpop.f32.mrb[1].mxu1 }
 0x3f1   : > { %v2399_v14 = vadd.f32 %v2398_v39, %v2397_v29  ;;  %v2400_v22 = vpop.f32.mrb[2].mxu1 }
 0x3f2   : > { %v2401_v49 = vpop.f32.mrb[3].mxu1 }
 0x3f3   : > { %v1931_v56 = vadd.f32 %v2399_v14, %v1578_v52  ;;  %v2402_v57 = vadd.f32 %v2401_v49, %v2400_v22  ;;  %v1591_v52 = vld [vmem:[#allocation3 + $0x68] sm:$0xff] }
 0x3f5   : > { %1963 = vst [vmem:[#allocation3] sm:$0xff] %v1931_v56  ;;  %v1932_v5 = vadd.f32 %v2402_v57, %v1579_v47  ;;  %v1592_v56 = vld [vmem:[#allocation3 + $0x70] sm:$0xff] }
 0x3f7   : > { %1964 = vst [vmem:[#allocation3 + $0x8] sm:$0xff] %v1932_v5  ;;  %v2403_v58 = vpop.f32.mrb[4].mxu1 }
 0x3f8   : > { %v2404_v19 = vpop.f32.mrb[5].mxu1 }
 0x3f9   : > { %v2405_v16 = vadd.f32 %v2404_v19, %v2403_v58  ;;  %v2406_v28 = vpop.f32.mrb[6].mxu1 }
 0x3fa   : > { %v2407_v32 = vpop.f32.mrb[7].mxu1 }
 0x3fb   : > { %v1933_v46 = vadd.f32 %v2405_v16, %v1580_v26  ;;  %v2408_v48 = vadd.f32 %v2407_v32, %v2406_v28  ;;  %v1593_v26 = vld [vmem:[#allocation3 + $0x78] sm:$0xff] }
 0x3fd   : > { %1965 = vst [vmem:[#allocation3 + $0x10] sm:$0xff] %v1933_v46  ;;  %v1934_v62 = vadd.f32 %v2408_v48, %v1581_v25  ;;  %v1594_v46 = vld [vmem:[#allocation3 + $0x80] sm:$0xff] }
 0x3ff   : > { %1966 = vst [vmem:[#allocation3 + $0x18] sm:$0xff] %v1934_v62  ;;  %v2409_v60 = vpop.f32.mrb[8].mxu1 }
 0x400   : > { %v2410_v8 = vpop.f32.mrb[9].mxu1 }
 0x401   : > { %v2411_v42 = vadd.f32 %v2410_v8, %v2409_v60  ;;  %v2412_v50 = vpop.f32.mrb[10].mxu1 }
 0x402   : > { %v2413_v54 = vpop.f32.mrb[11].mxu1 }
 0x403   : > { %v1935_v45 = vadd.f32 %v2411_v42, %v1582_v59  ;;  %v2414_v37 = vadd.f32 %v2413_v54, %v2412_v50  ;;  %v1595_v59 = vld [vmem:[#allocation3 + $0x88] sm:$0xff] }
 0x405   : > { %1967 = vst [vmem:[#allocation3 + $0x20] sm:$0xff] %v1935_v45  ;;  %v1936_v24 = vadd.f32 %v2414_v37, %v1583_v15  ;;  %v1596_v45 = vld [vmem:[#allocation3 + $0x90] sm:$0xff] }
 0x407   : > { %1968 = vst [vmem:[#allocation3 + $0x28] sm:$0xff] %v1936_v24  ;;  %v2415_v23 = vpop.f32.mrb[12].mxu1 }
 0x408   : > { %v2416_v55 = vpop.f32.mrb[13].mxu1 }
 0x409   : > { %v2417_v17 = vadd.f32 %v2416_v55, %v2415_v23  ;;  %v2418_v0 = vpop.f32.mrb[14].mxu1 }
 0x40a   : > { %v2419_v43 = vpop.f32.mrb[15].mxu1 }
 0x40b   : > { %v1937_v63 = vadd.f32 %v2417_v17, %v1584_v9  ;;  %v2420_v2 = vadd.f32 %v2419_v43, %v2418_v0  ;;  %v1597_v9 = vld [vmem:[#allocation3 + $0x98] sm:$0xff] }
 0x40d   : > { %1969 = vst [vmem:[#allocation3 + $0x30] sm:$0xff] %v1937_v63  ;;  %v1938_v6 = vadd.f32 %v2420_v2, %v1585_v53  ;;  %v1598_v63 = vld [vmem:[#allocation3 + $0xa0] sm:$0xff] }
 0x40f   : > { %1970 = vst [vmem:[#allocation3 + $0x38] sm:$0xff] %v1938_v6  ;;  %v2421_v38 = vpop.f32.mrb[16].mxu1 }
 0x410   : > { %v2422_v4 = vpop.f32.mrb[17].mxu1 }
 0x411   : > { %v2423_v40 = vadd.f32 %v2422_v4, %v2421_v38  ;;  %v2424_v35 = vpop.f32.mrb[18].mxu1 }
 0x412   : > { %v2425_v13 = vpop.f32.mrb[19].mxu1 }
 0x413   : > { %v1939_v31 = vadd.f32 %v2423_v40, %v1586_v12  ;;  %v2426_v36 = vadd.f32 %v2425_v13, %v2424_v35  ;;  %v1599_v12 = vld [vmem:[#allocation3 + $0xa8] sm:$0xff] }
 0x415   : > { %1971 = vst [vmem:[#allocation3 + $0x40] sm:$0xff] %v1939_v31  ;;  %v1940_v3 = vadd.f32 %v2426_v36, %v1587_v20  ;;  %v1600_v31 = vld [vmem:[#allocation3 + $0xb0] sm:$0xff] }
 0x417   : > { %1972 = vst [vmem:[#allocation3 + $0x48] sm:$0xff] %v1940_v3  ;;  %v2427_v21 = vpop.f32.mrb[20].mxu1 }
 0x418   : > { %v2428_v1 = vpop.f32.mrb[21].mxu1 }
 0x419   : > { %v2429_v51 = vadd.f32 %v2428_v1, %v2427_v21  ;;  %v2430_v33 = vpop.f32.mrb[22].mxu1 }
 0x41a   : > { %v2431_v7 = vpop.f32.mrb[23].mxu1 }
 0x41b   : > { %v1941_v41 = vadd.f32 %v2429_v51, %v1588_v10  ;;  %v2432_v27 = vadd.f32 %v2431_v7, %v2430_v33  ;;  %v1601_v10 = vld [vmem:[#allocation3 + $0xb8] sm:$0xff] }
 0x41d   : > { %1973 = vst [vmem:[#allocation3 + $0x50] sm:$0xff] %v1941_v41  ;;  %v1942_v11 = vadd.f32 %v2432_v27, %v1589_v18  ;;  %v1602_v41 = vld [vmem:[#allocation3 + $0xc0] sm:$0xff] }
 0x41f   : > { %1974 = vst [vmem:[#allocation3 + $0x58] sm:$0xff] %v1942_v11  ;;  %v2433_v61 = vpop.f32.mrb[24].mxu1 }
 0x420   : > { %v2434_v30 = vpop.f32.mrb[25].mxu1 }
 0x421   : > { %v2435_v44 = vadd.f32 %v2434_v30, %v2433_v61  ;;  %v2436_v29 = vpop.f32.mrb[26].mxu1 }
 0x422   : > { %v2437_v39 = vpop.f32.mrb[27].mxu1 }
 0x423   : > { %v1943_v14 = vadd.f32 %v2435_v44, %v1590_v34  ;;  %v2438_v22 = vadd.f32 %v2437_v39, %v2436_v29  ;;  %v1603_v34 = vld [vmem:[#allocation3 + $0xc8] sm:$0xff] }
 0x425   : > { %1975 = vst [vmem:[#allocation3 + $0x60] sm:$0xff] %v1943_v14  ;;  %v1944_v47 = vadd.f32 %v2438_v22, %v1591_v52  ;;  %v1604_v14 = vld [vmem:[#allocation3 + $0xd0] sm:$0xff] }
 0x427   : > { %1976 = vst [vmem:[#allocation3 + $0x68] sm:$0xff] %v1944_v47  ;;  %v2439_v49 = vpop.f32.mrb[28].mxu1 }
 0x428   : > { %v2440_v57 = vpop.f32.mrb[29].mxu1 }
 0x429   : > { %v2441_v5 = vadd.f32 %v2440_v57, %v2439_v49  ;;  %v2442_v58 = vpop.f32.mrb[30].mxu1 }
 0x42a   : > { %v2443_v19 = vpop.f32.mrb[31].mxu1 }
 0x42b   : > { %v1945_v16 = vadd.f32 %v2441_v5, %v1592_v56  ;;  %v2444_v28 = vadd.f32 %v2443_v19, %v2442_v58  ;;  %v1605_v56 = vld [vmem:[#allocation3 + $0xd8] sm:$0xff] }
 0x42d   : > { %1977 = vst [vmem:[#allocation3 + $0x70] sm:$0xff] %v1945_v16  ;;  %v1946_v25 = vadd.f32 %v2444_v28, %v1593_v26  ;;  %v1606_v16 = vld [vmem:[#allocation3 + $0xe0] sm:$0xff] }
 0x42f   : > { %1978 = vst [vmem:[#allocation3 + $0x78] sm:$0xff] %v1946_v25  ;;  %v2445_v32 = vpop.f32.mrb[32].mxu1 }
 0x430   : > { %v2446_v48 = vpop.f32.mrb[33].mxu1 }
 0x431   : > { %v2447_v62 = vadd.f32 %v2446_v48, %v2445_v32  ;;  %v2448_v60 = vpop.f32.mrb[34].mxu1 }
 0x432   : > { %v2449_v8 = vpop.f32.mrb[35].mxu1 }
 0x433   : > { %v1947_v42 = vadd.f32 %v2447_v62, %v1594_v46  ;;  %v2450_v50 = vadd.f32 %v2449_v8, %v2448_v60  ;;  %v1607_v46 = vld [vmem:[#allocation3 + $0xe8] sm:$0xff] }
 0x435   : > { %1979 = vst [vmem:[#allocation3 + $0x80] sm:$0xff] %v1947_v42  ;;  %v1948_v15 = vadd.f32 %v2450_v50, %v1595_v59  ;;  %v1608_v42 = vld [vmem:[#allocation3 + $0xf0] sm:$0xff] }
 0x437   : > { %1980 = vst [vmem:[#allocation3 + $0x88] sm:$0xff] %v1948_v15  ;;  %v2451_v54 = vpop.f32.mrb[36].mxu1 }
 0x438   : > { %v2452_v37 = vpop.f32.mrb[37].mxu1 }
 0x439   : > { %v2453_v24 = vadd.f32 %v2452_v37, %v2451_v54  ;;  %v2454_v23 = vpop.f32.mrb[38].mxu1 }
 0x43a   : > { %v2455_v55 = vpop.f32.mrb[39].mxu1 }
 0x43b   : > { %v1949_v17 = vadd.f32 %v2453_v24, %v1596_v45  ;;  %v2456_v0 = vadd.f32 %v2455_v55, %v2454_v23  ;;  %v1609_v45 = vld [vmem:[#allocation3 + $0xf8] sm:$0xff]  ;;  %v1999_v55 = vld [vmem:[#allocation3] sm:$0xff] (!%p2370_p2) }
 0x43d   : > { %1981 = vst [vmem:[#allocation3 + $0x90] sm:$0xff] %v1949_v17  ;;  %v1950_v53 = vadd.f32 %v2456_v0, %v1597_v9  ;;  %v4122_v17 = vld [vmem:[%s4348_s7] ss:$0 sm:$0xff] (!%p2370_p2) }
 0x43e   : > { %v2070_v0 = vld [vmem:[%s3393_s17] sm:$0xff] (!%p2370_p2) }
 0x43f   : > { %1982 = vst [vmem:[#allocation3 + $0x98] sm:$0xff] %v1950_v53  ;;  %v2457_v43 = vpop.f32.mrb[40].mxu1  ;;  %v2038_v53 = vadd.f32 (!%p2370_p2), %v4122_v17, %v1999_v55  ;;  %v2016_v55 = vld [vmem:[#allocation3 + $0x88] sm:$0xff] (!%p2370_p2) }
 0x440   : > { %v2458_v2 = vpop.f32.mrb[41].mxu1 }
 0x441   : > { %v2459_v6 = vadd.f32 %v2458_v2, %v2457_v43  ;;  %v2460_v38 = vpop.f32.mrb[42].mxu1  ;;  %v2000_v43 = vld [vmem:[#allocation3 + $0x8] sm:$0xff] (!%p2370_p2)  ;;  %v2001_v2 = vld [vmem:[#allocation3 + $0x10] sm:$0xff] (!%p2370_p2) }
 0x442   : > { %v2461_v4 = vpop.f32.mrb[43].mxu1 }
 0x443   : > { %v1951_v40 = vadd.f32 %v2459_v6, %v1598_v63  ;;  %v2462_v35 = vadd.f32 %v2461_v4, %v2460_v38  ;;  %v2071_v63 = vld [vmem:[%s3393_s17 + $0x8] sm:$0xff] (!%p2370_p2)  ;;  %v2039_v6 = vadd.f32 (!%p2370_p2), %v4122_v17, %v2000_v43  ;;  %v2040_v38 = vadd.f32 (!%p2370_p2), %v4122_v17, %v2001_v2  ;;  %v2002_v4 = vld [vmem:[#allocation3 + $0x18] sm:$0xff] (!%p2370_p2) }
 0x444   : > { %v2087_v2 = vld [vmem:[%s3393_s17 + $0x88] sm:$0xff] (!%p2370_p2) }
 0x445   : > { %1983 = vst [vmem:[#allocation3 + $0xa0] sm:$0xff] %v1951_v40  ;;  %v1952_v20 = vadd.f32 %v2462_v35, %v1599_v12  ;;  %v2072_v12 = vld [vmem:[%s3393_s17 + $0x10] sm:$0xff] (!%p2370_p2)  ;;  %v2073_v40 = vld [vmem:[%s3393_s17 + $0x18] sm:$0xff] (!%p2370_p2)  ;;  %v2102_v35 = vadd.f32 (!%p2370_p2), %v2070_v0, %v2038_v53 }
 0x447   : > { %1984 = vst [vmem:[#allocation3 + $0xa8] sm:$0xff] %v1952_v20  ;;  %v2463_v13 = vpop.f32.mrb[44].mxu1  ;;  %v2041_v20 = vadd.f32 (!%p2370_p2), %v4122_v17, %v2002_v4  ;;  %2134 = vst [vmem:[%s3416_s1] sm:$0xff] (!%p2370_p2), %v2102_v35  ;;  %v2089_v35 = vld [vmem:[%s3393_s17 + $0x98] sm:$0xff] (!%p2370_p2) }
 0x448   : > { %v2464_v36 = vpop.f32.mrb[45].mxu1 }
 0x449   : > { %v2465_v3 = vadd.f32 %v2464_v36, %v2463_v13  ;;  %v2466_v21 = vpop.f32.mrb[46].mxu1  ;;  %v2003_v13 = vld [vmem:[#allocation3 + $0x20] sm:$0xff] (!%p2370_p2)  ;;  %v2004_v36 = vld [vmem:[#allocation3 + $0x28] sm:$0xff] (!%p2370_p2) }
 0x44a   : > { %v2467_v1 = vpop.f32.mrb[47].mxu1 }
 0x44b   : > { %v1953_v51 = vadd.f32 %v2465_v3, %v1600_v31  ;;  %v2468_v33 = vadd.f32 %v2467_v1, %v2466_v21  ;;  %v2074_v31 = vld [vmem:[%s3393_s17 + $0x20] sm:$0xff] (!%p2370_p2)  ;;  %v2103_v3 = vadd.f32 (!%p2370_p2), %v2071_v63, %v2039_v6  ;;  %v2104_v21 = vadd.f32 (!%p2370_p2), %v2072_v12, %v2040_v38  ;;  %v2017_v6 = vld [vmem:[#allocation3 + $0x90] sm:$0xff] (!%p2370_p2) }
 0x44c   : > { %v2043_v1 = vadd.f32 (!%p2370_p2), %v4122_v17, %v2004_v36  ;;  %v2055_v63 = vadd.f32 (!%p2370_p2), %v4122_v17, %v2016_v55  ;;  %v2088_v38 = vld [vmem:[%s3393_s17 + $0x90] sm:$0xff] (!%p2370_p2)  ;;  %v2056_v4 = vadd.f32 (!%p2370_p2), %v4122_v17, %v2017_v6 }
 0x44d   : > { %1985 = vst [vmem:[#allocation3 + $0xb0] sm:$0xff] %v1953_v51  ;;  %v1954_v18 = vadd.f32 %v2468_v33, %v1601_v10  ;;  %v2042_v10 = vadd.f32 (!%p2370_p2), %v4122_v17, %v2003_v13  ;;  %v2075_v51 = vld [vmem:[%s3393_s17 + $0x28] sm:$0xff] (!%p2370_p2)  ;;  %v2005_v33 = vld [vmem:[#allocation3 + $0x30] sm:$0xff] (!%p2370_p2)  ;;  %2135 = vst [vmem:[%s3416_s1 + $0x8] sm:$0xff] (!%p2370_p2), %v2103_v3 }
 0x44e   : > { %2136 = vst [vmem:[%s3416_s1 + $0x10] sm:$0xff] (!%p2370_p2), %v2104_v21  ;;  %v2090_v21 = vld [vmem:[%s3393_s17 + $0xa0] sm:$0xff] (!%p2370_p2) }
 0x44f   : > { %1986 = vst [vmem:[#allocation3 + $0xb8] sm:$0xff] %v1954_v18  ;;  %v2469_v7 = vpop.f32.mrb[48].mxu1  ;;  %v2076_v18 = vld [vmem:[%s3393_s17 + $0x30] sm:$0xff] (!%p2370_p2) }
 0x450   : > { %v2470_v27 = vpop.f32.mrb[49].mxu1 }
 0x451   : > { %v2471_v11 = vadd.f32 %v2470_v27, %v2469_v7  ;;  %v2472_v61 = vpop.f32.mrb[50].mxu1  ;;  %v2105_v7 = vadd.f32 (!%p2370_p2), %v2073_v40, %v2041_v20  ;;  %v2006_v27 = vld [vmem:[#allocation3 + $0x38] sm:$0xff] (!%p2370_p2)  ;;  %v2019_v20 = vld [vmem:[#allocation3 + $0xa0] sm:$0xff] (!%p2370_p2) }
 0x452   : > { %v2473_v30 = vpop.f32.mrb[51].mxu1  ;;  %v2018_v40 = vld [vmem:[#allocation3 + $0x98] sm:$0xff] (!%p2370_p2)  ;;  %v2058_v3 = vadd.f32 (!%p2370_p2), %v4122_v17, %v2019_v20 }
 0x453   : > { %v1955_v44 = vadd.f32 %v2471_v11, %v1602_v41  ;;  %v2474_v29 = vadd.f32 %v2473_v30, %v2472_v61  ;;  %v2044_v41 = vadd.f32 (!%p2370_p2), %v4122_v17, %v2005_v33  ;;  %v2077_v11 = vld [vmem:[%s3393_s17 + $0x38] sm:$0xff] (!%p2370_p2)  ;;  %v2007_v61 = vld [vmem:[#allocation3 + $0x40] sm:$0xff] (!%p2370_p2)  ;;  %v2107_v30 = vadd.f32 (!%p2370_p2), %v2075_v51, %v2043_v1  ;;  %2137 = vst [vmem:[%s3416_s1 + $0x18] sm:$0xff] (!%p2370_p2), %v2105_v7  ;;  %v2091_v1 = vld [vmem:[%s3393_s17 + $0xa8] sm:$0xff] (!%p2370_p2) }
 0x454   : > { %v2057_v36 = vadd.f32 (!%p2370_p2), %v4122_v17, %v2018_v40  ;;  %v2120_v51 = vadd.f32 (!%p2370_p2), %v2088_v38, %v2056_v4  ;;  %v2092_v7 = vld [vmem:[%s3393_s17 + $0xb0] sm:$0xff] (!%p2370_p2) }
 0x455   : > { %1987 = vst [vmem:[#allocation3 + $0xc0] sm:$0xff] %v1955_v44  ;;  %v1956_v52 = vadd.f32 %v2474_v29, %v1603_v34  ;;  %v2106_v34 = vadd.f32 (!%p2370_p2), %v2074_v31, %v2042_v10  ;;  %v2045_v44 = vadd.f32 (!%p2370_p2), %v4122_v17, %v2006_v27  ;;  %v2046_v29 = vadd.f32 (!%p2370_p2), %v4122_v17, %v2007_v61  ;;  %v2020_v10 = vld [vmem:[#allocation3 + $0xa8] sm:$0xff] (!%p2370_p2) }
 0x456   : > { %2139 = vst [vmem:[%s3416_s1 + $0x28] sm:$0xff] (!%p2370_p2), %v2107_v30  ;;  %v2119_v31 = vadd.f32 (!%p2370_p2), %v2087_v2, %v2055_v63  ;;  %v2059_v33 = vadd.f32 (!%p2370_p2), %v4122_v17, %v2020_v10  ;;  %v2121_v27 = vadd.f32 (!%p2370_p2), %v2089_v35, %v2057_v36  ;;  %v2093_v30 = vld [vmem:[%s3393_s17 + $0xb8] sm:$0xff] (!%p2370_p2)  ;;  %2152 = vst [vmem:[%s3416_s1 + $0x90] sm:$0xff] (!%p2370_p2), %v2120_v51 }
 0x457   : > { %1988 = vst [vmem:[#allocation3 + $0xc8] sm:$0xff] %v1956_v52  ;;  %v2475_v39 = vpop.f32.mrb[52].mxu1  ;;  %v2078_v52 = vld [vmem:[%s3393_s17 + $0x40] sm:$0xff] (!%p2370_p2)  ;;  %2138 = vst [vmem:[%s3416_s1 + $0x20] sm:$0xff] (!%p2370_p2), %v2106_v34 }
 0x458   : > { %v2476_v22 = vpop.f32.mrb[53].mxu1  ;;  %2151 = vst [vmem:[%s3416_s1 + $0x88] sm:$0xff] (!%p2370_p2), %v2119_v31  ;;  %2153 = vst [vmem:[%s3416_s1 + $0x98] sm:$0xff] (!%p2370_p2), %v2121_v27 }
 0x459   : > { %v2477_v47 = vadd.f32 %v2476_v22, %v2475_v39  ;;  %v2478_v49 = vpop.f32.mrb[54].mxu1  ;;  %v2008_v39 = vld [vmem:[#allocation3 + $0x48] sm:$0xff] (!%p2370_p2)  ;;  %v2108_v22 = vadd.f32 (!%p2370_p2), %v2076_v18, %v2044_v41  ;;  %v2021_v18 = vld [vmem:[#allocation3 + $0xb0] sm:$0xff] (!%p2370_p2)  ;;  %v2022_v41 = vld [vmem:[#allocation3 + $0xb8] sm:$0xff] (!%p2370_p2) }
 0x45a   : > { %v2479_v57 = vpop.f32.mrb[55].mxu1  ;;  %v2060_v61 = vadd.f32 (!%p2370_p2), %v4122_v17, %v2021_v18  ;;  %v2061_v34 = vadd.f32 (!%p2370_p2), %v4122_v17, %v2022_v41 }
 0x45b   : > { %v1957_v5 = vadd.f32 %v2477_v47, %v1604_v14  ;;  %v2480_v58 = vadd.f32 %v2479_v57, %v2478_v49  ;;  %v2079_v14 = vld [vmem:[%s3393_s17 + $0x48] sm:$0xff] (!%p2370_p2)  ;;  %v2047_v47 = vadd.f32 (!%p2370_p2), %v4122_v17, %v2008_v39  ;;  %v2009_v49 = vld [vmem:[#allocation3 + $0x50] sm:$0xff] (!%p2370_p2)  ;;  %v2010_v57 = vld [vmem:[#allocation3 + $0x58] sm:$0xff] (!%p2370_p2)  ;;  %2140 = vst [vmem:[%s3416_s1 + $0x30] sm:$0xff] (!%p2370_p2), %v2108_v22 }
 0x45c   : > { %v2095_v22 = vld [vmem:[%s3393_s17 + $0xc8] sm:$0xff] (!%p2370_p2) }
 0x45d   : > { %1989 = vst [vmem:[#allocation3 + $0xd0] sm:$0xff] %v1957_v5  ;;  %v1958_v26 = vadd.f32 %v2480_v58, %v1605_v56  ;;  %v2080_v56 = vld [vmem:[%s3393_s17 + $0x50] sm:$0xff] (!%p2370_p2)  ;;  %v2109_v5 = vadd.f32 (!%p2370_p2), %v2077_v11, %v2045_v44  ;;  %v2110_v58 = vadd.f32 (!%p2370_p2), %v2078_v52, %v2046_v29  ;;  %v2122_v11 = vadd.f32 (!%p2370_p2), %v2090_v21, %v2058_v3  ;;  %v2023_v44 = vld [vmem:[#allocation3 + $0xc0] sm:$0xff] (!%p2370_p2) }
 0x45e   : > { %v2094_v29 = vld [vmem:[%s3393_s17 + $0xc0] sm:$0xff] (!%p2370_p2)  ;;  %v2123_v52 = vadd.f32 (!%p2370_p2), %v2091_v1, %v2059_v33  ;;  %v2062_v39 = vadd.f32 (!%p2370_p2), %v4122_v17, %v2023_v44 }
 0x45f   : > { %1990 = vst [vmem:[#allocation3 + $0xd8] sm:$0xff] %v1958_v26  ;;  %v2481_v19 = vpop.f32.mrb[56].mxu1  ;;  %v2048_v26 = vadd.f32 (!%p2370_p2), %v4122_v17, %v2009_v49  ;;  %2141 = vst [vmem:[%s3416_s1 + $0x38] sm:$0xff] (!%p2370_p2), %v2109_v5  ;;  %v2124_v49 = vadd.f32 (!%p2370_p2), %v2092_v7, %v2060_v61 }
 0x460   : > { %v2482_v28 = vpop.f32.mrb[57].mxu1  ;;  %2142 = vst [vmem:[%s3416_s1 + $0x40] sm:$0xff] (!%p2370_p2), %v2110_v58  ;;  %2154 = vst [vmem:[%s3416_s1 + $0xa0] sm:$0xff] (!%p2370_p2), %v2122_v11  ;;  %v2096_v58 = vld [vmem:[%s3393_s17 + $0xd0] sm:$0xff] (!%p2370_p2) }
 0x461   : > { %v2483_v25 = vadd.f32 %v2482_v28, %v2481_v19  ;;  %v2484_v32 = vpop.f32.mrb[58].mxu1  ;;  %v2049_v19 = vadd.f32 (!%p2370_p2), %v4122_v17, %v2010_v57  ;;  %v2011_v28 = vld [vmem:[#allocation3 + $0x60] sm:$0xff] (!%p2370_p2)  ;;  %2155 = vst [vmem:[%s3416_s1 + $0xa8] sm:$0xff] (!%p2370_p2), %v2123_v52  ;;  %2156 = vst [vmem:[%s3416_s1 + $0xb0] sm:$0xff] (!%p2370_p2), %v2124_v49 }
 0x462   : > { %v2485_v48 = vpop.f32.mrb[59].mxu1 }
 0x463   : > { %v1959_v62 = vadd.f32 %v2483_v25, %v1606_v16  ;;  %v2486_v60 = vadd.f32 %v2485_v48, %v2484_v32  ;;  %v2081_v16 = vld [vmem:[%s3393_s17 + $0x58] sm:$0xff] (!%p2370_p2)  ;;  %v2082_v25 = vld [vmem:[%s3393_s17 + $0x60] sm:$0xff] (!%p2370_p2)  ;;  %v2111_v32 = vadd.f32 (!%p2370_p2), %v2079_v14, %v2047_v47  ;;  %v2012_v48 = vld [vmem:[#allocation3 + $0x68] sm:$0xff] (!%p2370_p2) }
 0x464   : > { %v2024_v14 = vld [vmem:[#allocation3 + $0xc8] sm:$0xff] (!%p2370_p2)  ;;  %v2025_v47 = vld [vmem:[#allocation3 + $0xd0] sm:$0xff] (!%p2370_p2) }
 0x465   : > { %1991 = vst [vmem:[#allocation3 + $0xe0] sm:$0xff] %v1959_v62  ;;  %v1960_v59 = vadd.f32 %v2486_v60, %v1607_v46  ;;  %v2050_v46 = vadd.f32 (!%p2370_p2), %v4122_v17, %v2011_v28  ;;  %v2083_v62 = vld [vmem:[%s3393_s17 + $0x68] sm:$0xff] (!%p2370_p2)  ;;  %v2013_v60 = vld [vmem:[#allocation3 + $0x70] sm:$0xff] (!%p2370_p2)  ;;  %2143 = vst [vmem:[%s3416_s1 + $0x48] sm:$0xff] (!%p2370_p2), %v2111_v32  ;;  %v2063_v57 = vadd.f32 (!%p2370_p2), %v4122_v17, %v2024_v14 }
 0x466   : > { %v2064_v5 = vadd.f32 (!%p2370_p2), %v4122_v17, %v2025_v47  ;;  %v2098_v32 = vld [vmem:[%s3393_s17 + $0xe0] sm:$0xff] (!%p2370_p2) }
 0x467   : > { %1992 = vst [vmem:[#allocation3 + $0xe8] sm:$0xff] %v1960_v59  ;;  %v2487_v8 = vpop.f32.mrb[60].mxu1  ;;  %v2112_v59 = vadd.f32 (!%p2370_p2), %v2080_v56, %v2048_v26  ;;  %v2125_v56 = vadd.f32 (!%p2370_p2), %v2093_v30, %v2061_v34  ;;  %v2026_v26 = vld [vmem:[#allocation3 + $0xd8] sm:$0xff] (!%p2370_p2) }
 0x468   : > { %v2488_v50 = vpop.f32.mrb[61].mxu1  ;;  %v2065_v28 = vadd.f32 (!%p2370_p2), %v4122_v17, %v2026_v26 }
 0x469   : > { %v2489_v15 = vadd.f32 %v2488_v50, %v2487_v8  ;;  %v2490_v54 = vpop.f32.mrb[62].mxu1  ;;  %1998 = sbr.rel (%p2370_p2) target bundleno = 1148 (0x47c), region = 68  ;;  %v2113_v8 = vadd.f32 (!%p2370_p2), %v2081_v16, %v2049_v19  ;;  %v2052_v50 = vadd.f32 (!%p2370_p2), %v4122_v17, %v2013_v60  ;;  %2144 = vst [vmem:[%s3416_s1 + $0x50] sm:$0xff] (!%p2370_p2), %v2112_v59  ;;  %v2097_v19 = vld [vmem:[%s3393_s17 + $0xd8] sm:$0xff] (!%p2370_p2)  ;;  %v2126_v16 = vadd.f32 (!%p2370_p2), %v2094_v29, %v2062_v39 }
 0x46a   : > { %v2491_v37 = vpop.f32.mrb[63].mxu1  ;;  %2157 = vst [vmem:[%s3416_s1 + $0xb8] sm:$0xff] (!%p2370_p2), %v2125_v56 }
 0x46b   : > { %v1961_v24 = vadd.f32 %v2489_v15, %v1608_v42  ;;  %v2492_v23 = vadd.f32 %v2491_v37, %v2490_v54  ;;  %v2051_v42 = vadd.f32 (!%p2370_p2), %v4122_v17, %v2012_v48  ;;  %v2084_v15 = vld [vmem:[%s3393_s17 + $0x70] sm:$0xff] (!%p2370_p2)  ;;  %v2014_v54 = vld [vmem:[#allocation3 + $0x78] sm:$0xff] (!%p2370_p2)  ;;  %v2114_v37 = vadd.f32 (!%p2370_p2), %v2082_v25, %v2050_v46  ;;  %2145 = vst [vmem:[%s3416_s1 + $0x58] sm:$0xff] (!%p2370_p2), %v2113_v8  ;;  %v2099_v8 = vld [vmem:[%s3393_s17 + $0xe8] sm:$0xff] (!%p2370_p2) }
 0x46c   : > { %v2116_v53 = vadd.f32 (!%p2370_p2), %v2084_v15, %v2052_v50  ;;  %v2027_v25 = vld [vmem:[#allocation3 + $0xe0] sm:$0xff] (!%p2370_p2)  ;;  %v2127_v48 = vadd.f32 (!%p2370_p2), %v2095_v22, %v2063_v57  ;;  %v2100_v50 = vld [vmem:[%s3393_s17 + $0xf0] sm:$0xff] (!%p2370_p2)  ;;  %2158 = vst [vmem:[%s3416_s1 + $0xc0] sm:$0xff] (!%p2370_p2), %v2126_v16  ;;  %v2129_v15 = vadd.f32 (!%p2370_p2), %v2097_v19, %v2065_v28 }
 0x46d   : > { %1993 = vst [vmem:[#allocation3 + $0xf0] sm:$0xff] %v1961_v24  ;;  %v1962_v9 = vadd.f32 %v2492_v23, %v1609_v45  ;;  %v2085_v45 = vld [vmem:[%s3393_s17 + $0x78] sm:$0xff] (!%p2370_p2)  ;;  %v2053_v24 = vadd.f32 (!%p2370_p2), %v4122_v17, %v2014_v54  ;;  %v2015_v23 = vld [vmem:[#allocation3 + $0x80] sm:$0xff] (!%p2370_p2)  ;;  %v2115_v0 = vadd.f32 (!%p2370_p2), %v2083_v62, %v2051_v42  ;;  %2146 = vst [vmem:[%s3416_s1 + $0x60] sm:$0xff] (!%p2370_p2), %v2114_v37 }
 0x46e   : > { %v2054_v43 = vadd.f32 (!%p2370_p2), %v4122_v17, %v2015_v23  ;;  %2148 = vst [vmem:[%s3416_s1 + $0x70] sm:$0xff] (!%p2370_p2), %v2116_v53  ;;  %v2028_v46 = vld [vmem:[#allocation3 + $0xe8] sm:$0xff] (!%p2370_p2)  ;;  %v2128_v62 = vadd.f32 (!%p2370_p2), %v2096_v58, %v2064_v5  ;;  %v2066_v60 = vadd.f32 (!%p2370_p2), %v4122_v17, %v2027_v25  ;;  %v2101_v37 = vld [vmem:[%s3393_s17 + $0xf8] sm:$0xff] (!%p2370_p2)  ;;  %2159 = vst [vmem:[%s3416_s1 + $0xc8] sm:$0xff] (!%p2370_p2), %v2127_v48 }
 0x46f   : > { %1994 = vst [vmem:[#allocation3 + $0xf8] sm:$0xff] %v1962_v9  ;;  %v2086_v9 = vld [vmem:[%s3393_s17 + $0x80] sm:$0xff] (!%p2370_p2)  ;;  %v2117_v12 = vadd.f32 (!%p2370_p2), %v2085_v45, %v2053_v24  ;;  %2147 = vst [vmem:[%s3416_s1 + $0x68] sm:$0xff] (!%p2370_p2), %v2115_v0  ;;  %v2067_v59 = vadd.f32 (!%p2370_p2), %v4122_v17, %v2028_v46 }
 0x470   : > { %v2118_v13 = vadd.f32 %v2086_v9, %v2054_v43  ;;  %2160 = vst [vmem:[%s3416_s1 + $0xd0] sm:$0xff] %v2128_v62  ;;  %v2130_v24 = vadd.f32 %v2098_v32, %v2066_v60  ;;  %2161 = vst [vmem:[%s3416_s1 + $0xd8] sm:$0xff] %v2129_v15 }
 0x471   : > { %2149 = vst [vmem:[%s3416_s1 + $0x78] sm:$0xff] %v2117_v12  ;;  %v2131_v23 = vadd.f32 %v2099_v8, %v2067_v59 }
 0x472   : > { %2150 = vst [vmem:[%s3416_s1 + $0x80] sm:$0xff] %v2118_v13  ;;  %2162 = vst [vmem:[%s3416_s1 + $0xe0] sm:$0xff] %v2130_v24 }
 0x473   : > { %2163 = vst [vmem:[%s3416_s1 + $0xe8] sm:$0xff] %v2131_v23 }
 0x474   : > { %v2029_v42 = vld [vmem:[#allocation3 + $0xf0] sm:$0xff] }
 0x475   : > { %v2068_v54 = vadd.f32 %v4122_v17, %v2029_v42 }
 0x476   : > { %v2030_v45 = vld [vmem:[#allocation3 + $0xf8] sm:$0xff] }
 0x477   : > { %v2069_v9 = vadd.f32 %v4122_v17, %v2030_v45  ;;  %v2132_v55 = vadd.f32 %v2100_v50, %v2068_v54 }
 0x479   : > { %v2133_v0 = vadd.f32 %v2101_v37, %v2069_v9  ;;  %2164 = vst [vmem:[%s3416_s1 + $0xf0] sm:$0xff] %v2132_v55 }
 0x47b   : > { %2165 = vst [vmem:[%s3416_s1 + $0xf8] sm:$0xff] %v2133_v0 }
 0x47c PF: > { %s4349_s30 = sld [smem:[#allocation16_spill]]  ;;  %s2180_s12 = sshll.u32 %s3416_s1, 4  ;;  %s4227_s12 = int_to_ptr.vmem [resolvable:$true] %s2180_s12 }
 0x47d   : > { %s4350_s13 = sld [smem:[#allocation26_spill]]  ;;  %s2167_s8 = scalar_lea.sflag [#allocation6], %s3389_s3 }
 0x47e   : > { %s2936_s23 = scalar_lea.vmem %s4227_s12, 4096  ;;  %p4351_p11 = scmp.ne.s32.totalorder %s4334_s21, 0 }
 0x47f   : > { %p2937_p13 = scmp.ne.s32.totalorder %s4227_s12, %s2936_s23  ;;  %s3074_s2 = smov [#allocation10]  }
 0x480   : > { %s2940_s26 = sshll.u32 %s3074_s2, 4  ;;  %s2941_s26 = int_to_ptr.vmem [resolvable:$false] %s2940_s26 }
 0x481   : > { %p2938_p6 = pnand %p2937_p13, %p4351_p11  ;;  %s2942_s24 = scalar_lea.vmem %s2941_s26, 8192 }
 0x482   : > { %s2380_s20 = sshll.u32 %s4349_s30, 12  ;;  %p2943_p1 = scmp.lt.s32.totalorder %s4227_s12, %s2941_s26 }
 0x483   : > { %s4224_s29 = scalar_lea.hbm %s4350_s13, %s2380_s20  ;;  %p2939_p5 = pneg %p2938_p6 }
 0x484   : > { %p2944_p0 = scmp.lt.s32.totalorder %s2942_s24, %s2936_s23 }
 0x486   : > { %p2945_p9 = por %p2944_p0, %p2943_p1 }
 0x488   : > { %p2946_p12 = pnand %p2945_p9, %p2939_p5 }
 0x48a   : > { %2949 = shalt.err (!%p2946_p12)
}
 0x48b   : > { %s2950_s1 = scalar_lea.hbm %s4224_s29, 4096  ;;  %s2954_s19 = scalar_lea.hbm %s4350_s13, 12288 }
 0x48c   : > { %p2951_p3 = scmp.ne.s32.totalorder %s4224_s29, %s2950_s1  ;;  %p2955_p8 = scmp.lt.u32.totalorder %s4224_s29, %s4350_s13 }
 0x48d   : > { %p2956_p10 = scmp.lt.u32.totalorder %s2954_s19, %s2950_s1  ;;  %p2958_p13 = scmp.lt.u32.totalorder %s2950_s1, %s4224_s29 }
 0x48e   : > { %p2952_p4 = pnand %p2951_p3, %p4351_p11 }
 0x48f   : > { %p2957_p2 = por %p2956_p10, %p2955_p8 }
 0x490   : > { %p2953_p7 = pneg %p2952_p4 }
 0x491   : > { %p2959_p6 = por %p2958_p13, %p2957_p2 }
 0x493   : > { %p2960_p5 = pnand %p2959_p6, %p2953_p7 }
 0x495   : > { %2963 = shalt.err (!%p2960_p5)
}
 0x496   : > { %s3075_s16 = smov 128   ;;  %s3076_s7 = smov 8  }
 0x497   : > { %2499 = dma.vmem_to_hbm [thread:$0]  (%p4351_p11), %s4227_s12, 4096, %s4224_s29, %s2167_s8, %s3075_s16, %s3075_s16, %s3076_s7  }
 0x498 PF: > { %p2516_p1 = scmp.ge.s32.totalorder %s3062_s11, 2  ;;  %s2195_s30 = sand.u32 1, %s3034_s27  }
 0x499   : > { %p4352_p0 = scmp.ne.s32.totalorder %s4336_s6, 0  ;;  %s2196_s20 = scalar_lea.sflag [#allocation6], %s2195_s30 }
 0x49b   : > { %p2512_p9 = pnand %p2516_p1, %p4352_p0 }
 0x49d   : > { %3017 = dma.done.wait (!%p2512_p9), %s2196_s20, 4096  }
 0x49e   : > { %3019 = vsyncadd (!%p2512_p9), %s2196_s20, 4294963200  ;;  %s26_s11 = sadd.s32 1, %s3062_s11   ;;  %s4353_s17 = sld [smem:[#allocation14_spill]] }
 0x49f   : > { %p23_p12 = scmp.ge.s32.totalorder %s26_s11, 8   ;;  %s4354_s26 = sld [smem:[#allocation19_spill]] }
 0x4a0   : > { %s4355_s21 = sld [smem:[#allocation15_spill]]  ;;  %s4356_s29 = sld [smem:[#allocation21_spill]] }
 0x4a1   : > { %s4357_s8 = sld [smem:[#allocation17_spill]]  ;;  %s4358_s3 = sld [smem:[#allocation18_spill]] }
 0x4a2   : > { %s4359_s10 = sld [smem:[#allocation20_spill]]  ;;  %s4360_s24 = smov %s3026_s25 }
 0x4a3   : > { %s4362_s27 = smov %s3038_s28  ;;  %s4364_s30 = smov %s3054_s9 }
 0x4a4   : > { %s4361_s25 = smov %s4353_s17  ;;  %25 = sbr.rel (!%p23_p12) target bundleno = 17 (0x11), region = 128 }
 0x4a6   : > { %s4363_s28 = smov %s4355_s21 }
 0x4a7   : > { %s4365_s9 = smov %s4358_s3 }
 0x4ab   :  { %2201 = vsyncpa [#allocation5], 1 }
 0x4ac   :  { %2203 = vsyncpa [#allocation5 + $0x1], 1 }
 0x4ad   :  { %2204 = vsyncpa [#allocation8], 1 }
 0x4ae   :  { %2206 = vsyncpa [#allocation8 + $0x1], 1 }
 0x4af   :  { %2207 = vsyncpa [#allocation6], 1 }
 0x4b0   :  { %2209 = vsyncpa [#allocation6 + $0x1], 1 }

</bundles_post_ra>
